<compile_context>
chip_gen: v7x
topology: tpu7x:2x2x1
jax: 0.10.0
libtpu: 0.0.40
codegen_flags: <defaults>
</compile_context>

<pallas_src>
import math

import jax
import jax.numpy as jnp
from jax.experimental import pallas as pl
from jax.experimental.pallas import tpu as pltpu

# ---- synthetic "conf" (small shapes) -----------------------------------------
NUM_WORDS = 64
WORD_DIM = 32
NUM_FILTERS = 64
KERNEL_SIZE = 3          # conf.kernel_size (padding=1 => same-length output)
VERT_NUM = 16
VERT_EMB_DIM = 16
SUBVERT_NUM = 32
SUBVERT_EMB_DIM = 16
TITLE_LEN = 16
BODY_LEN = 32
HIS_SIZE = 4
NPRATIO = 3              # npratio + 1 candidate news per impression
BATCH = 2
LANES = 128


def _round_up(x, m):
    return ((x + m - 1) // m) * m


# ---- Pallas kernels -----------------------------------------------------------
def conv_attn_kernel(xp_ref, m_ref, w_ref, b_ref, aw_ref, ab_ref, o_ref):
    """Fused Conv1d(k=3, pad=1) + masked attention pooling for one news item.

    xp_ref: (1, L+2, D)  zero-padded embedded word sequence
    m_ref : (1, L, 1)    float mask (word id > 0)
    w_ref : (3, D, Fp)   conv taps, tap-major, already transposed to (D, F)
    b_ref : (1, Fp)      conv bias (zero-padded to Fp lanes)
    aw_ref: (Fp, 1)      attention Linear weight
    ab_ref: (1, 1)       attention Linear bias
    o_ref : (1, 1, Fp)   pooled representation
    """
    L = m_ref.shape[1]
    xp = xp_ref[0]                                                   # (L+2, D)
    y = jnp.dot(xp[0:L, :], w_ref[0], preferred_element_type=jnp.float32)
    y = y + jnp.dot(xp[1:L + 1, :], w_ref[1], preferred_element_type=jnp.float32)
    y = y + jnp.dot(xp[2:L + 2, :], w_ref[2], preferred_element_type=jnp.float32)
    y = y + b_ref[...]                                               # (L, Fp)

    s = jnp.dot(y, aw_ref[...], preferred_element_type=jnp.float32) + ab_ref[...]
    a = jnp.exp(jnp.tanh(s)) * m_ref[0]                              # (L, 1)
    alpha = a / (jnp.sum(a) + 1e-6)
    o_ref[0] = jnp.sum(alpha * y, axis=0, keepdims=True)             # (1, Fp)


def attn_pool_kernel(y_ref, w_ref, b_ref, o_ref):
    """tanh -> exp -> normalize attention pooling over K items (no mask).

    y_ref: (1, K, Fp); w_ref: (Fp, 1); b_ref: (1, 1); o_ref: (1, 1, Fp)
    """
    y = y_ref[0]                                                     # (K, Fp)
    s = jnp.dot(y, w_ref[...], preferred_element_type=jnp.float32) + b_ref[...]
    a = jnp.exp(jnp.tanh(s))                                         # (K, 1)
    alpha = a / (jnp.sum(a) + 1e-6)
    o_ref[0] = jnp.sum(alpha * y, axis=0, keepdims=True)             # (1, Fp)


def gather_row_kernel(ids_ref, row_ref, o_ref):
    # The gather happens in the BlockSpec index_map (scalar-prefetched ids in
    # SMEM); the body is a straight copy of the selected fused row.
    del ids_ref
    o_ref[...] = row_ref[...]


# ---- kernel wrappers ----------------------------------------------------------
def conv_attn_encode(ids, word_emb, conv_w, conv_b, attn_w, attn_b):
    """title/body encoder: word-emb gather (XLA) + fused conv+attention kernel."""
    n, seq_len = ids.shape
    d = word_emb.shape[1]
    fp = conv_w.shape[-1]
    x = jnp.take(word_emb, ids, axis=0)                       # (N, L, D)
    xp = jnp.pad(x, ((0, 0), (1, 1), (0, 0)))                 # conv zero padding
    mask = (ids > 0).astype(jnp.float32).reshape(n, seq_len, 1)
    out = pl.pallas_call(
        conv_attn_kernel,
        out_shape=jax.ShapeDtypeStruct((n, 1, fp), jnp.float32),
        grid=(n,),
        in_specs=[
            pl.BlockSpec((1, seq_len + 2, d), lambda i: (i, 0, 0)),
            pl.BlockSpec((1, seq_len, 1), lambda i: (i, 0, 0)),
            pl.BlockSpec((KERNEL_SIZE, d, fp), lambda i: (0, 0, 0)),
            pl.BlockSpec((1, fp), lambda i: (0, 0)),
            pl.BlockSpec((fp, 1), lambda i: (0, 0)),
            pl.BlockSpec((1, 1), lambda i: (0, 0)),
        ],
        out_specs=pl.BlockSpec((1, 1, fp), lambda i: (i, 0, 0)),
        compiler_params=pltpu.CompilerParams(dimension_semantics=("parallel",)),
    )(xp, mask, conv_w, conv_b, attn_w, attn_b)
    return out.reshape(n, fp)


def attn_combine(y, attn_w, attn_b):
    """news-level / user-level attention pooling over axis 1 of (G, K, Fp)."""
    g, k, fp = y.shape
    out = pl.pallas_call(
        attn_pool_kernel,
        out_shape=jax.ShapeDtypeStruct((g, 1, fp), jnp.float32),
        grid=(g,),
        in_specs=[
            pl.BlockSpec((1, k, fp), lambda i: (i, 0, 0)),
            pl.BlockSpec((fp, 1), lambda i: (0, 0)),
            pl.BlockSpec((1, 1), lambda i: (0, 0)),
        ],
        out_specs=pl.BlockSpec((1, 1, fp), lambda i: (i, 0, 0)),
        compiler_params=pltpu.CompilerParams(dimension_semantics=("parallel",)),
    )(y, attn_w, attn_b)
    return out.reshape(g, fp)


def cat_encode(ids, fused_table):
    """vert/subvert encoder: true row gather of the fused (emb @ W.T + b) table."""
    n = ids.shape[0]
    v, _, fp = fused_table.shape
    ids = jnp.clip(ids.astype(jnp.int32), 0, v - 1)   # OOB id must not become OOB DMA
    out = pl.pallas_call(
        gather_row_kernel,
        out_shape=jax.ShapeDtypeStruct((n, 1, fp), jnp.float32),
        grid_spec=pltpu.PrefetchScalarGridSpec(
            num_scalar_prefetch=1,
            grid=(n,),
            in_specs=[pl.BlockSpec((1, 1, fp), lambda i, ids_ref: (ids_ref[i], 0, 0))],
            out_specs=pl.BlockSpec((1, 1, fp), lambda i, ids_ref: (i, 0, 0)),
        ),
        compiler_params=pltpu.CompilerParams(dimension_semantics=("parallel",)),
    )(ids, fused_table)
    return out.reshape(n, fp)


# ---- parameter pre-processing (padding / algebraic fusion) --------------------
def _prep_conv(conv_w, conv_b, fp):
    f = conv_w.shape[0]
    w = jnp.transpose(conv_w, (2, 1, 0))              # (K, D, F): tap-major, (D, F) per tap
    w = jnp.pad(w, ((0, 0), (0, 0), (0, fp - f)))
    b = jnp.pad(conv_b, (0, fp - f)).reshape(1, fp)
    return w.astype(jnp.float32), b.astype(jnp.float32)


def _prep_attn(w, b, fp):
    f = w.shape[1]
    wp = jnp.pad(w, ((0, 0), (0, fp - f))).T          # (Fp, 1)
    return wp.astype(jnp.float32), b.reshape(1, 1).astype(jnp.float32)


def _prep_cat(emb, lin_w, lin_b, fp):
    f = lin_w.shape[0]
    fused = jnp.dot(emb, lin_w.T) + lin_b[None, :]    # input-independent fusion (V, F)
    fused = jnp.pad(fused, ((0, 0), (0, fp - f)))
    return fused.reshape(emb.shape[0], 1, fp).astype(jnp.float32)


# ---- full NAML forward (Pallas path) ------------------------------------------
@jax.jit
def naml_forward(params, his_news, pred_news, labels):
    fp = _round_up(NUM_FILTERS, LANES)

    t_conv_w, t_conv_b = _prep_conv(params['t_conv_w'], params['t_conv_b'], fp)
    b_conv_w, b_conv_b = _prep_conv(params['b_conv_w'], params['b_conv_b'], fp)
    t_attn_w, t_attn_b = _prep_attn(params['t_attn_w'], params['t_attn_b'], fp)
    b_attn_w, b_attn_b = _prep_attn(params['b_attn_w'], params['b_attn_b'], fp)
    n_attn_w, n_attn_b = _prep_attn(params['news_attn_w'], params['news_attn_b'], fp)
    u_attn_w, u_attn_b = _prep_attn(params['user_attn_w'], params['user_attn_b'], fp)
    vert_fused = _prep_cat(params['vert_emb'], params['vert_lin_w'], params['vert_lin_b'], fp)
    subvert_fused = _prep_cat(params['subvert_emb'], params['subvert_lin_w'],
                              params['subvert_lin_b'], fp)

    # Run each news-encoder kernel ONCE over his + pred items (bigger grid).
    t_ids = jnp.concatenate([his_news[0], pred_news[0]], axis=0)
    b_ids = jnp.concatenate([his_news[1], pred_news[1]], axis=0)
    v_ids = jnp.concatenate([his_news[2], pred_news[2]], axis=0)
    s_ids = jnp.concatenate([his_news[3], pred_news[3]], axis=0)

    t_repr = conv_attn_encode(t_ids, params['word_emb'], t_conv_w, t_conv_b, t_attn_w, t_attn_b)
    b_repr = conv_attn_encode(b_ids, params['word_emb'], b_conv_w, b_conv_b, b_attn_w, b_attn_b)
    v_repr = cat_encode(v_ids, vert_fused)
    s_repr = cat_encode(s_ids, subvert_fused)

    stacked = jnp.stack([t_repr, b_repr, v_repr, s_repr], axis=1)   # (N, 4, Fp)
    news_repr = attn_combine(stacked, n_attn_w, n_attn_b)           # (N, Fp)

    n_his = his_news[0].shape[0]
    bsz = n_his // HIS_SIZE
    his_repr = news_repr[:n_his].reshape(bsz, HIS_SIZE, fp)
    user_present = attn_combine(his_repr, u_attn_w, u_attn_b)       # (B, Fp)
    news_present = news_repr[n_his:].reshape(bsz, NPRATIO + 1, fp)

    # Pad columns are zero on both sides, so the Fp-dot equals the F-dot.
    preds = jnp.einsum('bcf,bf->bc', news_present, user_present)    # (B, npratio+1)
    logp = jax.nn.log_softmax(preds, axis=-1)
    loss = -jnp.mean(jnp.take_along_axis(logp, labels[:, None], axis=1)[:, 0])
    return loss, preds


# ---- pure-JAX reference (mirrors the PyTorch math, no Pallas) ------------------
def _ref_conv_attn(word_emb, ids, conv_w, conv_b, attn_w, attn_b):
    x = word_emb[ids]                                 # (N, L, D)
    xp = jnp.pad(x, ((0, 0), (1, 1), (0, 0)))
    seq_len = ids.shape[1]
    y = conv_b[None, None, :]
    for k in range(conv_w.shape[2]):
        y = y + jnp.einsum('nld,fd->nlf', xp[:, k:k + seq_len, :], conv_w[:, :, k])
    s = jnp.einsum('nlf,f->nl', y, attn_w[0]) + attn_b[0]
    a = jnp.exp(jnp.tanh(s)) * (ids > 0).astype(jnp.float32)
    alpha = a / (jnp.sum(a, axis=1, keepdims=True) + 1e-6)
    return jnp.einsum('nl,nlf->nf', alpha, y)


def _ref_attn_pool(y, w, b):
    s = jnp.einsum('nkf,f->nk', y, w[0]) + b[0]
    a = jnp.exp(jnp.tanh(s))
    alpha = a / (jnp.sum(a, axis=1, keepdims=True) + 1e-6)
    return jnp.einsum('nk,nkf->nf', alpha, y)


def _ref_cat(emb, ids, lin_w, lin_b):
    return jnp.dot(emb[ids], lin_w.T) + lin_b[None, :]


def ref_naml_forward(params, his_news, pred_news, labels):
    def encode(news):
        t_ids, b_ids, v_ids, s_ids = news
        t = _ref_conv_attn(params['word_emb'], t_ids, params['t_conv_w'],
                           params['t_conv_b'], params['t_attn_w'], params['t_attn_b'])
        bd = _ref_conv_attn(params['word_emb'], b_ids, params['b_conv_w'],
                            params['b_conv_b'], params['b_attn_w'], params['b_attn_b'])
        v = _ref_cat(params['vert_emb'], v_ids, params['vert_lin_w'], params['vert_lin_b'])
        s = _ref_cat(params['subvert_emb'], s_ids, params['subvert_lin_w'], params['subvert_lin_b'])
        stacked = jnp.stack([t, bd, v, s], axis=1)
        return _ref_attn_pool(stacked, params['news_attn_w'], params['news_attn_b'])

    his_repr = encode(his_news)
    pred_repr = encode(pred_news)
    bsz = his_repr.shape[0] // HIS_SIZE
    user_present = _ref_attn_pool(his_repr.reshape(bsz, HIS_SIZE, -1),
                                  params['user_attn_w'], params['user_attn_b'])
    news_present = pred_repr.reshape(bsz, NPRATIO + 1, -1)
    preds = jnp.einsum('bcf,bf->bc', news_present, user_present)
    logp = jax.nn.log_softmax(preds, axis=-1)
    loss = -jnp.mean(jnp.take_along_axis(logp, labels[:, None], axis=1)[:, 0])
    return loss, preds


# ---- deterministic parameter / input construction -----------------------------
def init_params(key):
    ks = jax.random.split(key, 11)

    def xavier(k, shape, fan_in, fan_out):
        limit = math.sqrt(6.0 / (fan_in + fan_out))
        return jax.random.uniform(k, shape, jnp.float32, -limit, limit)

    d, f, ksz = WORD_DIM, NUM_FILTERS, KERNEL_SIZE
    return dict(
        word_emb=jax.random.normal(ks[0], (NUM_WORDS, d), jnp.float32),
        t_conv_w=xavier(ks[1], (f, d, ksz), d * ksz, f * ksz),
        t_conv_b=jnp.zeros((f,), jnp.float32),
        t_attn_w=xavier(ks[2], (1, f), f, 1),
        t_attn_b=jnp.zeros((1,), jnp.float32),
        b_conv_w=xavier(ks[3], (f, d, ksz), d * ksz, f * ksz),
        b_conv_b=jnp.zeros((f,), jnp.float32),
        b_attn_w=xavier(ks[4], (1, f), f, 1),
        b_attn_b=jnp.zeros((1,), jnp.float32),
        vert_emb=jax.random.normal(ks[5], (VERT_NUM, VERT_EMB_DIM), jnp.float32),
        vert_lin_w=xavier(ks[6], (f, VERT_EMB_DIM), VERT_EMB_DIM, f),
        vert_lin_b=jnp.zeros((f,), jnp.float32),
        subvert_emb=jax.random.normal(ks[7], (SUBVERT_NUM, SUBVERT_EMB_DIM), jnp.float32),
        subvert_lin_w=xavier(ks[8], (f, SUBVERT_EMB_DIM), SUBVERT_EMB_DIM, f),
        subvert_lin_b=jnp.zeros((f,), jnp.float32),
        news_attn_w=xavier(ks[9], (1, f), f, 1),
        news_attn_b=jnp.zeros((1,), jnp.float32),
        user_attn_w=xavier(ks[10], (1, f), f, 1),
        user_attn_b=jnp.zeros((1,), jnp.float32),
    )


def make_news(key, n_items):
    k1, k2, k3, k4 = jax.random.split(key, 4)
    titles = jax.random.randint(k1, (n_items, TITLE_LEN), 0, NUM_WORDS, jnp.int32)
    bodies = jax.random.randint(k2, (n_items, BODY_LEN), 0, NUM_WORDS, jnp.int32)
    verts = jax.random.randint(k3, (n_items,), 0, VERT_NUM, jnp.int32)
    subverts = jax.random.randint(k4, (n_items,), 0, SUBVERT_NUM, jnp.int32)
    return (titles, bodies, verts, subverts)


if __name__ == "__main__":
    key = jax.random.PRNGKey(0)
    kp, kh, kc, kl = jax.random.split(key, 4)

    params = init_params(kp)
    his_news = make_news(kh, BATCH * HIS_SIZE)              # user click history
    pred_news = make_news(kc, BATCH * (NPRATIO + 1))        # candidate news
    labels = jax.random.randint(kl, (BATCH,), 0, NPRATIO + 1, jnp.int32)

    loss, preds = naml_forward(params, his_news, pred_news, labels)
    loss = jax.block_until_ready(loss)
    preds = jax.block_until_ready(preds)

    ref_loss, ref_preds = ref_naml_forward(params, his_news, pred_news, labels)

    assert preds.shape == (BATCH, NPRATIO + 1)
    assert bool(jnp.isfinite(loss)), "loss is not finite"
    assert bool(jnp.allclose(preds, ref_preds, atol=3e-2, rtol=3e-2)), \
        "preds mismatch vs pure-JAX reference"
    assert bool(jnp.allclose(loss, ref_loss, atol=3e-2, rtol=3e-2)), \
        "loss mismatch vs pure-JAX reference"

    print("KERNEL_OK")
</pallas_src>

<mosaic_0001>
module attributes {stable_mosaic.version = 11 : i64} {
  func.func @conv_attn_kernel(%arg0: i32, %arg1: memref<1x34x32xf32, #tpu.memory_space<vmem>>, %arg2: memref<1x32x1xf32, #tpu.memory_space<vmem>>, %arg3: memref<3x32x128xf32, #tpu.memory_space<vmem>>, %arg4: memref<1x128xf32, #tpu.memory_space<vmem>>, %arg5: memref<128x1xf32, #tpu.memory_space<vmem>>, %arg6: memref<1x1xf32, #tpu.memory_space<vmem>>, %arg7: memref<1x1x128xf32, #tpu.memory_space<vmem>>) attributes {dimension_semantics = [#tpu.dimension_semantics<parallel>], iteration_bounds = array<i64: 16>, scalar_prefetch = 0 : i64, scratch_operands = 0 : i64, tpu.core_type = #tpu.core_type<tc>, window_params = [{transform_indices = @transform_0, window_bounds = array<i64: 1, 34, 32>}, {transform_indices = @transform_1, window_bounds = array<i64: 1, 32, 1>}, {pipeline_mode = #tpu.pipeline_mode<synchronous>, transform_indices = @transform_2, window_bounds = array<i64: 3, 32, 128>}, {pipeline_mode = #tpu.pipeline_mode<synchronous>, transform_indices = @transform_3, window_bounds = array<i64: 1, 128>}, {pipeline_mode = #tpu.pipeline_mode<synchronous>, transform_indices = @transform_4, window_bounds = array<i64: 128, 1>}, {pipeline_mode = #tpu.pipeline_mode<synchronous>, transform_indices = @transform_5, window_bounds = array<i64: 1, 1>}, {transform_indices = @transform_6, window_bounds = array<i64: 1, 1, 128>}]} {
    %c0 = arith.constant 0 : index
    %c0_0 = arith.constant 0 : index
    %c0_1 = arith.constant 0 : index
    %0 = vector.load %arg1[%c0, %c0_0, %c0_1] : memref<1x34x32xf32, #tpu.memory_space<vmem>>, vector<1x34x32xf32>
    %1 = vector.shape_cast %0 : vector<1x34x32xf32> to vector<34x32xf32>
    %2 = vector.extract_strided_slice %1 {offsets = [0, 0], sizes = [32, 32], strides = [1, 1]} : vector<34x32xf32> to vector<32x32xf32>
    %c0_2 = arith.constant 0 : index
    %c0_3 = arith.constant 0 : index
    %c0_4 = arith.constant 0 : index
    %3 = vector.load %arg3[%c0_2, %c0_3, %c0_4] : memref<3x32x128xf32, #tpu.memory_space<vmem>>, vector<1x32x128xf32>
    %4 = vector.shape_cast %3 : vector<1x32x128xf32> to vector<32x128xf32>
    %cst = arith.constant dense<0.000000e+00> : vector<32x128xf32>
    %5 = tpu.matmul %2, %4, %cst {dimension_numbers = #tpu.dot_dimension_numbers<[1], [0], [0], [1], [0, 0, 1, 1], [], []>} : vector<32x32xf32>, vector<32x128xf32>, vector<32x128xf32> -> vector<32x128xf32>
    %6 = vector.extract_strided_slice %1 {offsets = [1, 0], sizes = [32, 32], strides = [1, 1]} : vector<34x32xf32> to vector<32x32xf32>
    %c1 = arith.constant 1 : index
    %c0_5 = arith.constant 0 : index
    %c0_6 = arith.constant 0 : index
    %7 = vector.load %arg3[%c1, %c0_5, %c0_6] : memref<3x32x128xf32, #tpu.memory_space<vmem>>, vector<1x32x128xf32>
    %8 = vector.shape_cast %7 : vector<1x32x128xf32> to vector<32x128xf32>
    %cst_7 = arith.constant dense<0.000000e+00> : vector<32x128xf32>
    %9 = tpu.matmul %6, %8, %cst_7 {dimension_numbers = #tpu.dot_dimension_numbers<[1], [0], [0], [1], [0, 0, 1, 1], [], []>} : vector<32x32xf32>, vector<32x128xf32>, vector<32x128xf32> -> vector<32x128xf32>
    %10 = arith.addf %5, %9 : vector<32x128xf32>
    %11 = vector.extract_strided_slice %1 {offsets = [2, 0], sizes = [32, 32], strides = [1, 1]} : vector<34x32xf32> to vector<32x32xf32>
    %c2 = arith.constant 2 : index
    %c0_8 = arith.constant 0 : index
    %c0_9 = arith.constant 0 : index
    %12 = vector.load %arg3[%c2, %c0_8, %c0_9] : memref<3x32x128xf32, #tpu.memory_space<vmem>>, vector<1x32x128xf32>
    %13 = vector.shape_cast %12 : vector<1x32x128xf32> to vector<32x128xf32>
    %cst_10 = arith.constant dense<0.000000e+00> : vector<32x128xf32>
    %14 = tpu.matmul %11, %13, %cst_10 {dimension_numbers = #tpu.dot_dimension_numbers<[1], [0], [0], [1], [0, 0, 1, 1], [], []>} : vector<32x32xf32>, vector<32x128xf32>, vector<32x128xf32> -> vector<32x128xf32>
    %15 = arith.addf %10, %14 : vector<32x128xf32>
    %c0_11 = arith.constant 0 : index
    %c0_12 = arith.constant 0 : index
    %16 = vector.load %arg4[%c0_11, %c0_12] : memref<1x128xf32, #tpu.memory_space<vmem>>, vector<1x128xf32>
    %17 = vector.broadcast %16 : vector<1x128xf32> to vector<32x128xf32>
    %18 = arith.addf %15, %17 : vector<32x128xf32>
    %c0_13 = arith.constant 0 : index
    %c0_14 = arith.constant 0 : index
    %19 = vector.load %arg5[%c0_13, %c0_14] : memref<128x1xf32, #tpu.memory_space<vmem>>, vector<128x1xf32>
    %cst_15 = arith.constant dense<0.000000e+00> : vector<32x1xf32>
    %20 = tpu.matmul %18, %19, %cst_15 {dimension_numbers = #tpu.dot_dimension_numbers<[1], [0], [0], [1], [0, 0, 1, 1], [], []>} : vector<32x128xf32>, vector<128x1xf32>, vector<32x1xf32> -> vector<32x1xf32>
    %c0_16 = arith.constant 0 : index
    %c0_17 = arith.constant 0 : index
    %21 = vector.load %arg6[%c0_16, %c0_17] : memref<1x1xf32, #tpu.memory_space<vmem>>, vector<1x1xf32>
    %22 = vector.broadcast %21 : vector<1x1xf32> to vector<32x1xf32>
    %23 = arith.addf %20, %22 : vector<32x1xf32>
    %24 = math.tanh %23 : vector<32x1xf32>
    %25 = math.exp %24 : vector<32x1xf32>
    %c0_18 = arith.constant 0 : index
    %c0_19 = arith.constant 0 : index
    %c0_20 = arith.constant 0 : index
    %26 = vector.load %arg2[%c0_18, %c0_19, %c0_20] : memref<1x32x1xf32, #tpu.memory_space<vmem>>, vector<1x32x1xf32>
    %27 = vector.shape_cast %26 : vector<1x32x1xf32> to vector<32x1xf32>
    %28 = arith.mulf %25, %27 : vector<32x1xf32>
    %29 = vector.shape_cast %28 : vector<32x1xf32> to vector<1x32x1xf32>
    %cst_21 = arith.constant dense<0.000000e+00> : vector<1xf32>
    %30 = vector.multi_reduction <add>, %29, %cst_21 [1, 2] : vector<1x32x1xf32> to vector<1xf32>
    %31 = vector.shape_cast %30 : vector<1xf32> to vector<1x1x1xf32>
    %32 = vector.extract %31[0, 0, 0] : f32 from vector<1x1x1xf32>
    %cst_22 = arith.constant 9.99999997E-7 : f32
    %33 = arith.addf %32, %cst_22 : f32
    %34 = vector.broadcast %33 : f32 to vector<32x1xf32>
    %35 = arith.divf %28, %34 : vector<32x1xf32>
    %36 = vector.broadcast %35 : vector<32x1xf32> to vector<32x128xf32>
    %37 = arith.mulf %36, %18 : vector<32x128xf32>
    %cst_23 = arith.constant dense<0.000000e+00> : vector<128xf32>
    %38 = vector.multi_reduction <add>, %37, %cst_23 [0] : vector<32x128xf32> to vector<128xf32>
    %39 = vector.shape_cast %38 : vector<128xf32> to vector<1x128xf32>
    %c0_24 = arith.constant 0 : index
    %c0_25 = arith.constant 0 : index
    %c0_26 = arith.constant 0 : index
    %40 = vector.load %arg7[%c0_24, %c0_25, %c0_26] : memref<1x1x128xf32, #tpu.memory_space<vmem>>, vector<1x1x128xf32>
    %41 = vector.shape_cast %40 : vector<1x1x128xf32> to vector<1x128xf32>
    %42 = vector.shape_cast %39 : vector<1x128xf32> to vector<1x1x128xf32>
    tpu.vector_store %arg7[%c0_24, %c0_25, %c0_26], %42 {strides = array<i32>} : memref<1x1x128xf32, #tpu.memory_space<vmem>>, vector<1x1x128xf32>,
    return
  }
  func.func @transform_0(%arg0: i32) -> (i32, i32, i32) {
    %c0_i32 = arith.constant 0 : i32
    %c0_i32_0 = arith.constant 0 : i32
    %c0_i32_1 = arith.constant 0 : i32
    return %arg0, %c0_i32, %c0_i32_0 : i32, i32, i32
  }
  func.func @transform_1(%arg0: i32) -> (i32, i32, i32) {
    %c0_i32 = arith.constant 0 : i32
    %c0_i32_0 = arith.constant 0 : i32
    %c0_i32_1 = arith.constant 0 : i32
    return %arg0, %c0_i32, %c0_i32_0 : i32, i32, i32
  }
  func.func @transform_2(%arg0: i32) -> (i32, i32, i32) {
    %c0_i32 = arith.constant 0 : i32
    %c0_i32_0 = arith.constant 0 : i32
    %c0_i32_1 = arith.constant 0 : i32
    %c0_i32_2 = arith.constant 0 : i32
    return %c0_i32, %c0_i32_0, %c0_i32_1 : i32, i32, i32
  }
  func.func @transform_3(%arg0: i32) -> (i32, i32) {
    %c0_i32 = arith.constant 0 : i32
    %c0_i32_0 = arith.constant 0 : i32
    %c0_i32_1 = arith.constant 0 : i32
    return %c0_i32, %c0_i32_0 : i32, i32
  }
  func.func @transform_4(%arg0: i32) -> (i32, i32) {
    %c0_i32 = arith.constant 0 : i32
    %c0_i32_0 = arith.constant 0 : i32
    %c0_i32_1 = arith.constant 0 : i32
    return %c0_i32, %c0_i32_0 : i32, i32
  }
  func.func @transform_5(%arg0: i32) -> (i32, i32) {
    %c0_i32 = arith.constant 0 : i32
    %c0_i32_0 = arith.constant 0 : i32
    %c0_i32_1 = arith.constant 0 : i32
    return %c0_i32, %c0_i32_0 : i32, i32
  }
  func.func @transform_6(%arg0: i32) -> (i32, i32, i32) {
    %c0_i32 = arith.constant 0 : i32
    %c0_i32_0 = arith.constant 0 : i32
    %c0_i32_1 = arith.constant 0 : i32
    return %arg0, %c0_i32, %c0_i32_0 : i32, i32, i32
  }
}

module attributes {stable_mosaic.version = 11 : i64} {
  func.func @conv_attn_kernel(%arg0: i32, %arg1: memref<1x18x32xf32, #tpu.memory_space<vmem>>, %arg2: memref<1x16x1xf32, #tpu.memory_space<vmem>>, %arg3: memref<3x32x128xf32, #tpu.memory_space<vmem>>, %arg4: memref<1x128xf32, #tpu.memory_space<vmem>>, %arg5: memref<128x1xf32, #tpu.memory_space<vmem>>, %arg6: memref<1x1xf32, #tpu.memory_space<vmem>>, %arg7: memref<1x1x128xf32, #tpu.memory_space<vmem>>) attributes {dimension_semantics = [#tpu.dimension_semantics<parallel>], iteration_bounds = array<i64: 16>, scalar_prefetch = 0 : i64, scratch_operands = 0 : i64, tpu.core_type = #tpu.core_type<tc>, window_params = [{transform_indices = @transform_0, window_bounds = array<i64: 1, 18, 32>}, {transform_indices = @transform_1, window_bounds = array<i64: 1, 16, 1>}, {pipeline_mode = #tpu.pipeline_mode<synchronous>, transform_indices = @transform_2, window_bounds = array<i64: 3, 32, 128>}, {pipeline_mode = #tpu.pipeline_mode<synchronous>, transform_indices = @transform_3, window_bounds = array<i64: 1, 128>}, {pipeline_mode = #tpu.pipeline_mode<synchronous>, transform_indices = @transform_4, window_bounds = array<i64: 128, 1>}, {pipeline_mode = #tpu.pipeline_mode<synchronous>, transform_indices = @transform_5, window_bounds = array<i64: 1, 1>}, {transform_indices = @transform_6, window_bounds = array<i64: 1, 1, 128>}]} {
    %c0 = arith.constant 0 : index
    %c0_0 = arith.constant 0 : index
    %c0_1 = arith.constant 0 : index
    %0 = vector.load %arg1[%c0, %c0_0, %c0_1] : memref<1x18x32xf32, #tpu.memory_space<vmem>>, vector<1x18x32xf32>
    %1 = vector.shape_cast %0 : vector<1x18x32xf32> to vector<18x32xf32>
    %2 = vector.extract_strided_slice %1 {offsets = [0, 0], sizes = [16, 32], strides = [1, 1]} : vector<18x32xf32> to vector<16x32xf32>
    %c0_2 = arith.constant 0 : index
    %c0_3 = arith.constant 0 : index
    %c0_4 = arith.constant 0 : index
    %3 = vector.load %arg3[%c0_2, %c0_3, %c0_4] : memref<3x32x128xf32, #tpu.memory_space<vmem>>, vector<1x32x128xf32>
    %4 = vector.shape_cast %3 : vector<1x32x128xf32> to vector<32x128xf32>
    %cst = arith.constant dense<0.000000e+00> : vector<16x128xf32>
    %5 = tpu.matmul %2, %4, %cst {dimension_numbers = #tpu.dot_dimension_numbers<[1], [0], [0], [1], [0, 0, 1, 1], [], []>} : vector<16x32xf32>, vector<32x128xf32>, vector<16x128xf32> -> vector<16x128xf32>
    %6 = vector.extract_strided_slice %1 {offsets = [1, 0], sizes = [16, 32], strides = [1, 1]} : vector<18x32xf32> to vector<16x32xf32>
    %c1 = arith.constant 1 : index
    %c0_5 = arith.constant 0 : index
    %c0_6 = arith.constant 0 : index
    %7 = vector.load %arg3[%c1, %c0_5, %c0_6] : memref<3x32x128xf32, #tpu.memory_space<vmem>>, vector<1x32x128xf32>
    %8 = vector.shape_cast %7 : vector<1x32x128xf32> to vector<32x128xf32>
    %cst_7 = arith.constant dense<0.000000e+00> : vector<16x128xf32>
    %9 = tpu.matmul %6, %8, %cst_7 {dimension_numbers = #tpu.dot_dimension_numbers<[1], [0], [0], [1], [0, 0, 1, 1], [], []>} : vector<16x32xf32>, vector<32x128xf32>, vector<16x128xf32> -> vector<16x128xf32>
    %10 = arith.addf %5, %9 : vector<16x128xf32>
    %11 = vector.extract_strided_slice %1 {offsets = [2, 0], sizes = [16, 32], strides = [1, 1]} : vector<18x32xf32> to vector<16x32xf32>
    %c2 = arith.constant 2 : index
    %c0_8 = arith.constant 0 : index
    %c0_9 = arith.constant 0 : index
    %12 = vector.load %arg3[%c2, %c0_8, %c0_9] : memref<3x32x128xf32, #tpu.memory_space<vmem>>, vector<1x32x128xf32>
    %13 = vector.shape_cast %12 : vector<1x32x128xf32> to vector<32x128xf32>
    %cst_10 = arith.constant dense<0.000000e+00> : vector<16x128xf32>
    %14 = tpu.matmul %11, %13, %cst_10 {dimension_numbers = #tpu.dot_dimension_numbers<[1], [0], [0], [1], [0, 0, 1, 1], [], []>} : vector<16x32xf32>, vector<32x128xf32>, vector<16x128xf32> -> vector<16x128xf32>
    %15 = arith.addf %10, %14 : vector<16x128xf32>
    %c0_11 = arith.constant 0 : index
    %c0_12 = arith.constant 0 : index
    %16 = vector.load %arg4[%c0_11, %c0_12] : memref<1x128xf32, #tpu.memory_space<vmem>>, vector<1x128xf32>
    %17 = vector.broadcast %16 : vector<1x128xf32> to vector<16x128xf32>
    %18 = arith.addf %15, %17 : vector<16x128xf32>
    %c0_13 = arith.constant 0 : index
    %c0_14 = arith.constant 0 : index
    %19 = vector.load %arg5[%c0_13, %c0_14] : memref<128x1xf32, #tpu.memory_space<vmem>>, vector<128x1xf32>
    %cst_15 = arith.constant dense<0.000000e+00> : vector<16x1xf32>
    %20 = tpu.matmul %18, %19, %cst_15 {dimension_numbers = #tpu.dot_dimension_numbers<[1], [0], [0], [1], [0, 0, 1, 1], [], []>} : vector<16x128xf32>, vector<128x1xf32>, vector<16x1xf32> -> vector<16x1xf32>
    %c0_16 = arith.constant 0 : index
    %c0_17 = arith.constant 0 : index
    %21 = vector.load %arg6[%c0_16, %c0_17] : memref<1x1xf32, #tpu.memory_space<vmem>>, vector<1x1xf32>
    %22 = vector.broadcast %21 : vector<1x1xf32> to vector<16x1xf32>
    %23 = arith.addf %20, %22 : vector<16x1xf32>
    %24 = math.tanh %23 : vector<16x1xf32>
    %25 = math.exp %24 : vector<16x1xf32>
    %c0_18 = arith.constant 0 : index
    %c0_19 = arith.constant 0 : index
    %c0_20 = arith.constant 0 : index
    %26 = vector.load %arg2[%c0_18, %c0_19, %c0_20] : memref<1x16x1xf32, #tpu.memory_space<vmem>>, vector<1x16x1xf32>
    %27 = vector.shape_cast %26 : vector<1x16x1xf32> to vector<16x1xf32>
    %28 = arith.mulf %25, %27 : vector<16x1xf32>
    %29 = vector.shape_cast %28 : vector<16x1xf32> to vector<1x16x1xf32>
    %cst_21 = arith.constant dense<0.000000e+00> : vector<1xf32>
    %30 = vector.multi_reduction <add>, %29, %cst_21 [1, 2] : vector<1x16x1xf32> to vector<1xf32>
    %31 = vector.shape_cast %30 : vector<1xf32> to vector<1x1x1xf32>
    %32 = vector.extract %31[0, 0, 0] : f32 from vector<1x1x1xf32>
    %cst_22 = arith.constant 9.99999997E-7 : f32
    %33 = arith.addf %32, %cst_22 : f32
    %34 = vector.broadcast %33 : f32 to vector<16x1xf32>
    %35 = arith.divf %28, %34 : vector<16x1xf32>
    %36 = vector.broadcast %35 : vector<16x1xf32> to vector<16x128xf32>
    %37 = arith.mulf %36, %18 : vector<16x128xf32>
    %cst_23 = arith.constant dense<0.000000e+00> : vector<128xf32>
    %38 = vector.multi_reduction <add>, %37, %cst_23 [0] : vector<16x128xf32> to vector<128xf32>
    %39 = vector.shape_cast %38 : vector<128xf32> to vector<1x128xf32>
    %c0_24 = arith.constant 0 : index
    %c0_25 = arith.constant 0 : index
    %c0_26 = arith.constant 0 : index
    %40 = vector.load %arg7[%c0_24, %c0_25, %c0_26] : memref<1x1x128xf32, #tpu.memory_space<vmem>>, vector<1x1x128xf32>
    %41 = vector.shape_cast %40 : vector<1x1x128xf32> to vector<1x128xf32>
    %42 = vector.shape_cast %39 : vector<1x128xf32> to vector<1x1x128xf32>
    tpu.vector_store %arg7[%c0_24, %c0_25, %c0_26], %42 {strides = array<i32>} : memref<1x1x128xf32, #tpu.memory_space<vmem>>, vector<1x1x128xf32>,
    return
  }
  func.func @transform_0(%arg0: i32) -> (i32, i32, i32) {
    %c0_i32 = arith.constant 0 : i32
    %c0_i32_0 = arith.constant 0 : i32
    %c0_i32_1 = arith.constant 0 : i32
    return %arg0, %c0_i32, %c0_i32_0 : i32, i32, i32
  }
  func.func @transform_1(%arg0: i32) -> (i32, i32, i32) {
    %c0_i32 = arith.constant 0 : i32
    %c0_i32_0 = arith.constant 0 : i32
    %c0_i32_1 = arith.constant 0 : i32
    return %arg0, %c0_i32, %c0_i32_0 : i32, i32, i32
  }
  func.func @transform_2(%arg0: i32) -> (i32, i32, i32) {
    %c0_i32 = arith.constant 0 : i32
    %c0_i32_0 = arith.constant 0 : i32
    %c0_i32_1 = arith.constant 0 : i32
    %c0_i32_2 = arith.constant 0 : i32
    return %c0_i32, %c0_i32_0, %c0_i32_1 : i32, i32, i32
  }
  func.func @transform_3(%arg0: i32) -> (i32, i32) {
    %c0_i32 = arith.constant 0 : i32
    %c0_i32_0 = arith.constant 0 : i32
    %c0_i32_1 = arith.constant 0 : i32
    return %c0_i32, %c0_i32_0 : i32, i32
  }
  func.func @transform_4(%arg0: i32) -> (i32, i32) {
    %c0_i32 = arith.constant 0 : i32
    %c0_i32_0 = arith.constant 0 : i32
    %c0_i32_1 = arith.constant 0 : i32
    return %c0_i32, %c0_i32_0 : i32, i32
  }
  func.func @transform_5(%arg0: i32) -> (i32, i32) {
    %c0_i32 = arith.constant 0 : i32
    %c0_i32_0 = arith.constant 0 : i32
    %c0_i32_1 = arith.constant 0 : i32
    return %c0_i32, %c0_i32_0 : i32, i32
  }
  func.func @transform_6(%arg0: i32) -> (i32, i32, i32) {
    %c0_i32 = arith.constant 0 : i32
    %c0_i32_0 = arith.constant 0 : i32
    %c0_i32_1 = arith.constant 0 : i32
    return %arg0, %c0_i32, %c0_i32_0 : i32, i32, i32
  }
}

module attributes {stable_mosaic.version = 11 : i64} {
  func.func @gather_row_kernel(%arg0: i32, %arg1: memref<16xi32, #tpu.memory_space<smem>>, %arg2: memref<1x1x128xf32, #tpu.memory_space<vmem>>, %arg3: memref<1x1x128xf32, #tpu.memory_space<vmem>>) attributes {dimension_semantics = [#tpu.dimension_semantics<parallel>], iteration_bounds = array<i64: 16>, scalar_prefetch = 1 : i64, scratch_operands = 0 : i64, tpu.core_type = #tpu.core_type<tc>, window_params = [{transform_indices = @transform_0, window_bounds = array<i64: 1, 1, 128>}, {transform_indices = @transform_1, window_bounds = array<i64: 1, 1, 128>}]} {
    %c0 = arith.constant 0 : index
    %c0_0 = arith.constant 0 : index
    %c0_1 = arith.constant 0 : index
    %0 = vector.load %arg2[%c0, %c0_0, %c0_1] : memref<1x1x128xf32, #tpu.memory_space<vmem>>, vector<1x1x128xf32>
    %c0_2 = arith.constant 0 : index
    %c0_3 = arith.constant 0 : index
    %c0_4 = arith.constant 0 : index
    %1 = vector.load %arg3[%c0_2, %c0_3, %c0_4] : memref<1x1x128xf32, #tpu.memory_space<vmem>>, vector<1x1x128xf32>
    tpu.vector_store %arg3[%c0_2, %c0_3, %c0_4], %0 {strides = array<i32>} : memref<1x1x128xf32, #tpu.memory_space<vmem>>, vector<1x1x128xf32>,
    return
  }
  func.func @transform_0(%arg0: i32, %arg1: memref<16xi32, #tpu.memory_space<smem>>) -> (i32, i32, i32) {
    %0 = arith.index_cast %arg0 : i32 to index
    %1 = memref.load %arg1[%0] : memref<16xi32, #tpu.memory_space<smem>>
    %c0_i32 = arith.constant 0 : i32
    %c0_i32_0 = arith.constant 0 : i32
    %c0_i32_1 = arith.constant 0 : i32
    return %1, %c0_i32, %c0_i32_0 : i32, i32, i32
  }
  func.func @transform_1(%arg0: i32, %arg1: memref<16xi32, #tpu.memory_space<smem>>) -> (i32, i32, i32) {
    %c0_i32 = arith.constant 0 : i32
    %c0_i32_0 = arith.constant 0 : i32
    %c0_i32_1 = arith.constant 0 : i32
    return %arg0, %c0_i32, %c0_i32_0 : i32, i32, i32
  }
}

module attributes {stable_mosaic.version = 11 : i64} {
  func.func @gather_row_kernel(%arg0: i32, %arg1: memref<16xi32, #tpu.memory_space<smem>>, %arg2: memref<1x1x128xf32, #tpu.memory_space<vmem>>, %arg3: memref<1x1x128xf32, #tpu.memory_space<vmem>>) attributes {dimension_semantics = [#tpu.dimension_semantics<parallel>], iteration_bounds = array<i64: 16>, scalar_prefetch = 1 : i64, scratch_operands = 0 : i64, tpu.core_type = #tpu.core_type<tc>, window_params = [{transform_indices = @transform_0, window_bounds = array<i64: 1, 1, 128>}, {transform_indices = @transform_1, window_bounds = array<i64: 1, 1, 128>}]} {
    %c0 = arith.constant 0 : index
    %c0_0 = arith.constant 0 : index
    %c0_1 = arith.constant 0 : index
    %0 = vector.load %arg2[%c0, %c0_0, %c0_1] : memref<1x1x128xf32, #tpu.memory_space<vmem>>, vector<1x1x128xf32>
    %c0_2 = arith.constant 0 : index
    %c0_3 = arith.constant 0 : index
    %c0_4 = arith.constant 0 : index
    %1 = vector.load %arg3[%c0_2, %c0_3, %c0_4] : memref<1x1x128xf32, #tpu.memory_space<vmem>>, vector<1x1x128xf32>
    tpu.vector_store %arg3[%c0_2, %c0_3, %c0_4], %0 {strides = array<i32>} : memref<1x1x128xf32, #tpu.memory_space<vmem>>, vector<1x1x128xf32>,
    return
  }
  func.func @transform_0(%arg0: i32, %arg1: memref<16xi32, #tpu.memory_space<smem>>) -> (i32, i32, i32) {
    %0 = arith.index_cast %arg0 : i32 to index
    %1 = memref.load %arg1[%0] : memref<16xi32, #tpu.memory_space<smem>>
    %c0_i32 = arith.constant 0 : i32
    %c0_i32_0 = arith.constant 0 : i32
    %c0_i32_1 = arith.constant 0 : i32
    return %1, %c0_i32, %c0_i32_0 : i32, i32, i32
  }
  func.func @transform_1(%arg0: i32, %arg1: memref<16xi32, #tpu.memory_space<smem>>) -> (i32, i32, i32) {
    %c0_i32 = arith.constant 0 : i32
    %c0_i32_0 = arith.constant 0 : i32
    %c0_i32_1 = arith.constant 0 : i32
    return %arg0, %c0_i32, %c0_i32_0 : i32, i32, i32
  }
}

module attributes {stable_mosaic.version = 11 : i64} {
  func.func @attn_pool_kernel(%arg0: i32, %arg1: memref<1x4x128xf32, #tpu.memory_space<vmem>>, %arg2: memref<128x1xf32, #tpu.memory_space<vmem>>, %arg3: memref<1x1xf32, #tpu.memory_space<vmem>>, %arg4: memref<1x1x128xf32, #tpu.memory_space<vmem>>) attributes {dimension_semantics = [#tpu.dimension_semantics<parallel>], iteration_bounds = array<i64: 16>, scalar_prefetch = 0 : i64, scratch_operands = 0 : i64, tpu.core_type = #tpu.core_type<tc>, window_params = [{transform_indices = @transform_0, window_bounds = array<i64: 1, 4, 128>}, {pipeline_mode = #tpu.pipeline_mode<synchronous>, transform_indices = @transform_1, window_bounds = array<i64: 128, 1>}, {pipeline_mode = #tpu.pipeline_mode<synchronous>, transform_indices = @transform_2, window_bounds = array<i64: 1, 1>}, {transform_indices = @transform_3, window_bounds = array<i64: 1, 1, 128>}]} {
    %c0 = arith.constant 0 : index
    %c0_0 = arith.constant 0 : index
    %c0_1 = arith.constant 0 : index
    %0 = vector.load %arg1[%c0, %c0_0, %c0_1] : memref<1x4x128xf32, #tpu.memory_space<vmem>>, vector<1x4x128xf32>
    %1 = vector.shape_cast %0 : vector<1x4x128xf32> to vector<4x128xf32>
    %c0_2 = arith.constant 0 : index
    %c0_3 = arith.constant 0 : index
    %2 = vector.load %arg2[%c0_2, %c0_3] : memref<128x1xf32, #tpu.memory_space<vmem>>, vector<128x1xf32>
    %cst = arith.constant dense<0.000000e+00> : vector<4x1xf32>
    %3 = tpu.matmul %1, %2, %cst {dimension_numbers = #tpu.dot_dimension_numbers<[1], [0], [0], [1], [0, 0, 1, 1], [], []>} : vector<4x128xf32>, vector<128x1xf32>, vector<4x1xf32> -> vector<4x1xf32>
    %c0_4 = arith.constant 0 : index
    %c0_5 = arith.constant 0 : index
    %4 = vector.load %arg3[%c0_4, %c0_5] : memref<1x1xf32, #tpu.memory_space<vmem>>, vector<1x1xf32>
    %5 = vector.broadcast %4 : vector<1x1xf32> to vector<4x1xf32>
    %6 = arith.addf %3, %5 : vector<4x1xf32>
    %7 = math.tanh %6 : vector<4x1xf32>
    %8 = math.exp %7 : vector<4x1xf32>
    %9 = vector.shape_cast %8 : vector<4x1xf32> to vector<1x4x1xf32>
    %cst_6 = arith.constant dense<0.000000e+00> : vector<1xf32>
    %10 = vector.multi_reduction <add>, %9, %cst_6 [1, 2] : vector<1x4x1xf32> to vector<1xf32>
    %11 = vector.shape_cast %10 : vector<1xf32> to vector<1x1x1xf32>
    %12 = vector.extract %11[0, 0, 0] : f32 from vector<1x1x1xf32>
    %cst_7 = arith.constant 9.99999997E-7 : f32
    %13 = arith.addf %12, %cst_7 : f32
    %14 = vector.broadcast %13 : f32 to vector<4x1xf32>
    %15 = arith.divf %8, %14 : vector<4x1xf32>
    %16 = vector.broadcast %15 : vector<4x1xf32> to vector<4x128xf32>
    %17 = arith.mulf %16, %1 : vector<4x128xf32>
    %cst_8 = arith.constant dense<0.000000e+00> : vector<128xf32>
    %18 = vector.multi_reduction <add>, %17, %cst_8 [0] : vector<4x128xf32> to vector<128xf32>
    %19 = vector.shape_cast %18 : vector<128xf32> to vector<1x128xf32>
    %c0_9 = arith.constant 0 : index
    %c0_10 = arith.constant 0 : index
    %c0_11 = arith.constant 0 : index
    %20 = vector.load %arg4[%c0_9, %c0_10, %c0_11] : memref<1x1x128xf32, #tpu.memory_space<vmem>>, vector<1x1x128xf32>
    %21 = vector.shape_cast %20 : vector<1x1x128xf32> to vector<1x128xf32>
    %22 = vector.shape_cast %19 : vector<1x128xf32> to vector<1x1x128xf32>
    tpu.vector_store %arg4[%c0_9, %c0_10, %c0_11], %22 {strides = array<i32>} : memref<1x1x128xf32, #tpu.memory_space<vmem>>, vector<1x1x128xf32>,
    return
  }
  func.func @transform_0(%arg0: i32) -> (i32, i32, i32) {
    %c0_i32 = arith.constant 0 : i32
    %c0_i32_0 = arith.constant 0 : i32
    %c0_i32_1 = arith.constant 0 : i32
    return %arg0, %c0_i32, %c0_i32_0 : i32, i32, i32
  }
  func.func @transform_1(%arg0: i32) -> (i32, i32) {
    %c0_i32 = arith.constant 0 : i32
    %c0_i32_0 = arith.constant 0 : i32
    %c0_i32_1 = arith.constant 0 : i32
    return %c0_i32, %c0_i32_0 : i32, i32
  }
  func.func @transform_2(%arg0: i32) -> (i32, i32) {
    %c0_i32 = arith.constant 0 : i32
    %c0_i32_0 = arith.constant 0 : i32
    %c0_i32_1 = arith.constant 0 : i32
    return %c0_i32, %c0_i32_0 : i32, i32
  }
  func.func @transform_3(%arg0: i32) -> (i32, i32, i32) {
    %c0_i32 = arith.constant 0 : i32
    %c0_i32_0 = arith.constant 0 : i32
    %c0_i32_1 = arith.constant 0 : i32
    return %arg0, %c0_i32, %c0_i32_0 : i32, i32, i32
  }
}

module attributes {stable_mosaic.version = 11 : i64} {
  func.func @attn_pool_kernel(%arg0: i32, %arg1: memref<1x4x128xf32, #tpu.memory_space<vmem>>, %arg2: memref<128x1xf32, #tpu.memory_space<vmem>>, %arg3: memref<1x1xf32, #tpu.memory_space<vmem>>, %arg4: memref<1x1x128xf32, #tpu.memory_space<vmem>>) attributes {dimension_semantics = [#tpu.dimension_semantics<parallel>], iteration_bounds = array<i64: 2>, scalar_prefetch = 0 : i64, scratch_operands = 0 : i64, tpu.core_type = #tpu.core_type<tc>, window_params = [{transform_indices = @transform_0, window_bounds = array<i64: 1, 4, 128>}, {pipeline_mode = #tpu.pipeline_mode<synchronous>, transform_indices = @transform_1, window_bounds = array<i64: 128, 1>}, {pipeline_mode = #tpu.pipeline_mode<synchronous>, transform_indices = @transform_2, window_bounds = array<i64: 1, 1>}, {transform_indices = @transform_3, window_bounds = array<i64: 1, 1, 128>}]} {
    %c0 = arith.constant 0 : index
    %c0_0 = arith.constant 0 : index
    %c0_1 = arith.constant 0 : index
    %0 = vector.load %arg1[%c0, %c0_0, %c0_1] : memref<1x4x128xf32, #tpu.memory_space<vmem>>, vector<1x4x128xf32>
    %1 = vector.shape_cast %0 : vector<1x4x128xf32> to vector<4x128xf32>
    %c0_2 = arith.constant 0 : index
    %c0_3 = arith.constant 0 : index
    %2 = vector.load %arg2[%c0_2, %c0_3] : memref<128x1xf32, #tpu.memory_space<vmem>>, vector<128x1xf32>
    %cst = arith.constant dense<0.000000e+00> : vector<4x1xf32>
    %3 = tpu.matmul %1, %2, %cst {dimension_numbers = #tpu.dot_dimension_numbers<[1], [0], [0], [1], [0, 0, 1, 1], [], []>} : vector<4x128xf32>, vector<128x1xf32>, vector<4x1xf32> -> vector<4x1xf32>
    %c0_4 = arith.constant 0 : index
    %c0_5 = arith.constant 0 : index
    %4 = vector.load %arg3[%c0_4, %c0_5] : memref<1x1xf32, #tpu.memory_space<vmem>>, vector<1x1xf32>
    %5 = vector.broadcast %4 : vector<1x1xf32> to vector<4x1xf32>
    %6 = arith.addf %3, %5 : vector<4x1xf32>
    %7 = math.tanh %6 : vector<4x1xf32>
    %8 = math.exp %7 : vector<4x1xf32>
    %9 = vector.shape_cast %8 : vector<4x1xf32> to vector<1x4x1xf32>
    %cst_6 = arith.constant dense<0.000000e+00> : vector<1xf32>
    %10 = vector.multi_reduction <add>, %9, %cst_6 [1, 2] : vector<1x4x1xf32> to vector<1xf32>
    %11 = vector.shape_cast %10 : vector<1xf32> to vector<1x1x1xf32>
    %12 = vector.extract %11[0, 0, 0] : f32 from vector<1x1x1xf32>
    %cst_7 = arith.constant 9.99999997E-7 : f32
    %13 = arith.addf %12, %cst_7 : f32
    %14 = vector.broadcast %13 : f32 to vector<4x1xf32>
    %15 = arith.divf %8, %14 : vector<4x1xf32>
    %16 = vector.broadcast %15 : vector<4x1xf32> to vector<4x128xf32>
    %17 = arith.mulf %16, %1 : vector<4x128xf32>
    %cst_8 = arith.constant dense<0.000000e+00> : vector<128xf32>
    %18 = vector.multi_reduction <add>, %17, %cst_8 [0] : vector<4x128xf32> to vector<128xf32>
    %19 = vector.shape_cast %18 : vector<128xf32> to vector<1x128xf32>
    %c0_9 = arith.constant 0 : index
    %c0_10 = arith.constant 0 : index
    %c0_11 = arith.constant 0 : index
    %20 = vector.load %arg4[%c0_9, %c0_10, %c0_11] : memref<1x1x128xf32, #tpu.memory_space<vmem>>, vector<1x1x128xf32>
    %21 = vector.shape_cast %20 : vector<1x1x128xf32> to vector<1x128xf32>
    %22 = vector.shape_cast %19 : vector<1x128xf32> to vector<1x1x128xf32>
    tpu.vector_store %arg4[%c0_9, %c0_10, %c0_11], %22 {strides = array<i32>} : memref<1x1x128xf32, #tpu.memory_space<vmem>>, vector<1x1x128xf32>,
    return
  }
  func.func @transform_0(%arg0: i32) -> (i32, i32, i32) {
    %c0_i32 = arith.constant 0 : i32
    %c0_i32_0 = arith.constant 0 : i32
    %c0_i32_1 = arith.constant 0 : i32
    return %arg0, %c0_i32, %c0_i32_0 : i32, i32, i32
  }
  func.func @transform_1(%arg0: i32) -> (i32, i32) {
    %c0_i32 = arith.constant 0 : i32
    %c0_i32_0 = arith.constant 0 : i32
    %c0_i32_1 = arith.constant 0 : i32
    return %c0_i32, %c0_i32_0 : i32, i32
  }
  func.func @transform_2(%arg0: i32) -> (i32, i32) {
    %c0_i32 = arith.constant 0 : i32
    %c0_i32_0 = arith.constant 0 : i32
    %c0_i32_1 = arith.constant 0 : i32
    return %c0_i32, %c0_i32_0 : i32, i32
  }
  func.func @transform_3(%arg0: i32) -> (i32, i32, i32) {
    %c0_i32 = arith.constant 0 : i32
    %c0_i32_0 = arith.constant 0 : i32
    %c0_i32_1 = arith.constant 0 : i32
    return %arg0, %c0_i32, %c0_i32_0 : i32, i32, i32
  }
}

</mosaic_0001>

<bundles_post_ra>
// kernel: naml_forward.9
= control target key start
LH: loop header
LB: loop body
LE: loop exit
PB: predicated region body
PF: predicated region fallthrough
CT: control target
= control target key end

     0   :  { %s230_s0 = inlined_call_operand.vmem [shape: s32[16], index: 0, kind: input, shape index: {}]   ;;  %s231_s1 = inlined_call_operand.vmem [shape: f32[32,1,128], index: 1, kind: input, shape index: {}]   ;;  %s232_s2 = inlined_call_operand.vmem [shape: f32[16,1,128], index: 2, kind: output, shape index: {}]  }
   0x1   :  { %s7_s11 = sshll.u32 %s230_s0, 4  ;;  %s8_s11 = int_to_ptr.vmem [resolvable:$true] %s7_s11 }
   0x2   :  { %s183_s12 = scalar_lea.vmem %s8_s11, 16  ;;  %p188_p1 = scmp.lt.s32.totalorder %s8_s11, %s8_s11 }
   0x3   :  { %p184_p0 = scmp.ne.s32.totalorder %s8_s11, %s183_s12  ;;  %p189_p2 = scmp.lt.s32.totalorder %s183_s12, %s183_s12 }
   0x5   :  { %p190_p3 = por %p189_p2, %p188_p1 }
   0x7   :  { %p191_p4 = pnand %p190_p3, %p184_p0 }
   0x9   :  { %194 = shalt.err (!%p191_p4)  }
   0xa   :  { %s205_s13 = smov [#allocation3]  }
   0xb   :  { %10 = dma.vmem_to_smem %s8_s11, 16, %s205_s13, [#allocation2] }
   0xc   :  { %199 = dma.done.wait [#allocation2], 16 }
   0xd   :  { %200 = vsyncadd [#allocation2], 4294967280 }
   0xe   :  { %12 = sfence }
   0xf   :  { %s201_s14 = smov 0  }
  0x10 LB: > { %s167_s15 = sadd.s32 4294967295, %s203_s14   ;;  %p171_p5 = scmp.ge.s32.totalorder %s203_s14, 1  ;;  %s203_s14 = sphi %s201_s14, %s18_s14  }
  0x11   : > { %p96_p6 = scmp.lt.s32.totalorder %s203_s14, 17 }
  0x13   : > { %p97_p7 = pnand %p171_p5, %p96_p6 }
  0x14   : > { %s113_s0 = sld [smem:[#allocation3 + %s167_s15]] (!%p97_p7)  ;;  %p118_p8 = scmp.lt.s32.totalorder (!%p97_p7), %s167_s15, 15 }
  0x15   : > { %100 = sbr.rel (%p97_p7) target bundleno = 32 (0x20), region = 24 }
  0x1a   : > { %p114_p9 = scmp.lt.s32.totalorder (!%p97_p7), %s113_s0, 31 }
  0x1c   : > { %s234_s15 = smov (!%p118_p8, %s167_s15), 15  ;;  %s236_s0 = smov (!%p114_p9, %s113_s0), 31 }
  0x1d   : > { %s120_s18 = scalar_lea.vmem %s232_s2, %s234_s15  ;;  %s116_s21 = scalar_lea.vmem %s231_s1, %s236_s0 }
  0x1e   : > { %v121_v0 = vld [vmem:[%s116_s21] sm:$0x1] }
  0x1f   : > { %122 = vst [vmem:[%s120_s18] sm:$0x1] %v121_v0 }
  0x20 PF: > { %s18_s14 = sadd.s32 1, %s203_s14  }
  0x21   : > { %p15_p10 = scmp.ge.s32.totalorder %s18_s14, 18  }
  0x23   :  { %17 = sbr.rel (!%p15_p10) target bundleno = 16 (0x10), region = 54 }

// kernel: naml_forward.6
= control target key start
LH: loop header
LB: loop body
LE: loop exit
PB: predicated region body
PF: predicated region fallthrough
CT: control target
= control target key end

     0   :  { %s1018_s23 = smov 0   ;;  %s1138_s0 = inlined_call_operand.vmem [shape: f32[16,18,32], index: 0, kind: input, shape index: {}]   ;;  %s1139_s1 = inlined_call_operand.vmem [shape: f32[16,16,1], index: 1, kind: input, shape index: {}]   ;;  %s1140_s2 = inlined_call_operand.vmem [shape: f32[3,32,128], index: 2, kind: input, shape index: {}]   ;;  %s1141_s3 = inlined_call_operand.vmem [shape: f32[1,128], index: 3, kind: input, shape index: {}]   ;;  %s1142_s4 = inlined_call_operand.vmem [shape: f32[128,1], index: 4, kind: input, shape index: {}]   ;;  %s1143_s5 = inlined_call_operand.<no memory space> [shape: f32[1,1], index: 5, kind: input, shape index: {}]   ;;  %s1144_s6 = inlined_call_operand.vmem [shape: f32[16,1,128], index: 6, kind: output, shape index: {}]  }
   0x1   :  { %v11_v0 = vstv %s1143_s5 }
   0x2   :  { %12 = vst [vmem:[#allocation2] sm:$0x1] %v11_v0 }
   0x3 LB: > { %s756_s24 = sadd.s32 4294967295, %s977_s23   ;;  %p760_p0 = scmp.ge.s32.totalorder %s977_s23, 1  ;;  %s977_s23 = sphi %s1018_s23, %s18_s23  }
   0x4   : > { %p224_p1 = scmp.lt.s32.totalorder %s977_s23, 17 }
   0x6   : > { %p225_p2 = pnand %p760_p0, %p224_p1 }
   0x7   : > { %v764_v1 = vld [vmem:[%s1140_s2 + $0x20] sm:$0xff] (!%p225_p2)  ;;  %v765_v2 = vld [vmem:[%s1140_s2 + $0x28] sm:$0xff] (!%p225_p2)  ;;  %v766_v3 = vld [vmem:[%s1140_s2 + $0x30] sm:$0xff] (!%p225_p2)  ;;  %p257_p3 = scmp.lt.s32.totalorder (!%p225_p2), %s756_s24, 15  ;;  %vm285_vm0 = vcmask (!%p225_p2), 1046528   ;;  %vm291_vm1 = vcmask (!%p225_p2), 261120  }
   0x8   : > { %228 = sbr.rel (%p225_p2) target bundleno = 865 (0x361), region = 44  ;;  %v887_v4 = vpack.c.bf16 (!%p225_p2), %v765_v2, %v764_v1  ;;  %v767_v5 = vld [vmem:[%s1140_s2 + $0x38] sm:$0xff] (!%p225_p2)  ;;  %v273_v7 = vld [vmem:[%s1140_s2] sm:$0xff] (!%p225_p2)  ;;  %v274_v8 = vld [vmem:[%s1140_s2 + $0x8] sm:$0xff] (!%p225_p2)  ;;  %vm455_vm2 = vcmask (!%p225_p2), 1045504   ;;  %vm659_vm3 = vcmask (!%p225_p2), 7168  }
   0x9   : > { %v891_v6 = vpack.c.bf16 (!%p225_p2), %v767_v5, %v766_v3  ;;  %v551_v9 = vld [vmem:[%s1142_s4] sm:$0xff] (!%p225_p2)  ;;  %v552_v10 = vld [vmem:[%s1142_s4 + $0x8] sm:$0xff] (!%p225_p2)  ;;  %v553_v11 = vld [vmem:[%s1142_s4 + $0x10] sm:$0xff] (!%p225_p2)  ;;  %v895_v12 = vpack.c.bf16 (!%p225_p2), %v274_v8, %v273_v7 }
   0xa   : > { %888 = vmatprep.subr.bf16.mxu0 (!%p225_p2), %v887_v4  ;;  %v275_v13 = vld [vmem:[%s1140_s2 + $0x10] sm:$0xff] (!%p225_p2)  ;;  %v911_v14 = vpack.c.bf16 (!%p225_p2), %v552_v10, %v551_v9  ;;  %v554_v15 = vld [vmem:[%s1142_s4 + $0x18] sm:$0xff] (!%p225_p2)  ;;  %v555_v18 = vld [vmem:[%s1142_s4 + $0x20] sm:$0xff] (!%p225_p2) }
   0xb   : > { %890 = vmatpush3.bf16.msra.mxu0 (!%p225_p2), %v887_v4  ;;  %v276_v16 = vld [vmem:[%s1140_s2 + $0x18] sm:$0xff] (!%p225_p2)  ;;  %v915_v17 = vpack.c.bf16 (!%p225_p2), %v554_v15, %v553_v11  ;;  %v556_v19 = vld [vmem:[%s1142_s4 + $0x28] sm:$0xff] (!%p225_p2)  ;;  %v557_v30 = vld [vmem:[%s1142_s4 + $0x30] sm:$0xff] (!%p225_p2)  ;;  %v979_v15 = vmov (!%p225_p2), 0  }
   0xc   : > { %892 = vmatprep.subr.bf16.mxu0 (!%p225_p2), %v891_v6  ;;  %912 = vmatprep.subr.bf16.mxu1 (!%p225_p2), %v911_v14  ;;  %v899_v28 = vpack.c.bf16 (!%p225_p2), %v276_v16, %v275_v13  ;;  %v919_v29 = vpack.c.bf16 (!%p225_p2), %v556_v19, %v555_v18  ;;  %v558_v31 = vld [vmem:[%s1142_s4 + $0x38] sm:$0xff] (!%p225_p2)  ;;  %v772_v32 = vld [vmem:[%s1140_s2 + $0x40] sm:$0xff] (!%p225_p2)  ;;  %v773_v33 = vld [vmem:[%s1140_s2 + $0x48] sm:$0xff] (!%p225_p2) }
   0xd   : > { %914 = vmatpush3.bf16.msra.mxu1 (!%p225_p2), %v911_v14  ;;  %v923_v34 = vpack.c.bf16 (!%p225_p2), %v558_v31, %v557_v30  ;;  %v903_v35 = vpack.c.bf16 (!%p225_p2), %v773_v33, %v772_v32  ;;  %v774_v36 = vld [vmem:[%s1140_s2 + $0x50] sm:$0xff] (!%p225_p2)  ;;  %v775_v39 = vld [vmem:[%s1140_s2 + $0x58] sm:$0xff] (!%p225_p2)  ;;  %v559_v40 = vld [vmem:[%s1142_s4 + $0x40] sm:$0xff] (!%p225_p2)  ;;  %960 = vset.pattern.permute.xlu1 (!%p225_p2), %v979_v15 }
   0xe   : > { %916 = vmatprep.subr.bf16.mxu1 (!%p225_p2), %v915_v17  ;;  %v560_v41 = vld [vmem:[%s1142_s4 + $0x48] sm:$0xff] (!%p225_p2)  ;;  %v907_v42 = vpack.c.bf16 (!%p225_p2), %v775_v39, %v774_v36  ;;  %v561_v45 = vld [vmem:[%s1142_s4 + $0x50] sm:$0xff] (!%p225_p2)  ;;  %v562_v46 = vld [vmem:[%s1142_s4 + $0x58] sm:$0xff] (!%p225_p2)  ;;  %959 = vset.pattern.permute.xlu0 (!%p225_p2), %v979_v15 }
   0xf   : > { %s1146_s24 = smov (!%p257_p3, %s756_s24), 15  ;;  %894 = vmatpush3.bf16.msra.mxu0 %v891_v6  ;;  %v927_v44 = vpack.c.bf16 %v560_v41, %v559_v40  ;;  %v931_v48 = vpack.c.bf16 %v562_v46, %v561_v45  ;;  %v563_v49 = vld [vmem:[%s1142_s4 + $0x60] sm:$0xff]  ;;  %v564_v50 = vld [vmem:[%s1142_s4 + $0x68] sm:$0xff]  ;;  %v565_v53 = vld [vmem:[%s1142_s4 + $0x70] sm:$0xff] }
  0x10   : > { %s947_s12 = smul.u32 24, %s1146_s24  ;;  %896 = vmatprep.subr.bf16.mxu0 %v895_v12  ;;  %v935_v52 = vpack.c.bf16 %v564_v50, %v563_v49  ;;  %v566_v54 = vld [vmem:[%s1142_s4 + $0x78] sm:$0xff]  ;;  %v778_v56 = vld [vmem:[%s1141_s3] ss:$0 sm:$0xff]  ;;  %s782_s16 = sshll.u32 %s1146_s24, 4 }
  0x11   : > { %918 = vmatpush3.bf16.msra.mxu1 %v915_v17  ;;  %v939_v55 = vpack.c.bf16 %v566_v54, %v565_v53  ;;  %v779_v61 = vld [vmem:[#allocation2] ss:$0 sm:$0xff]  ;;  %s266_s19 = scalar_lea.vmem %s1139_s1, %s782_s16  ;;  %s269_s26 = scalar_lea.vmem %s1144_s6, %s1146_s24 }
  0x12   : > { %s261_s5 = scalar_lea.vmem %s1138_s0, %s947_s12  ;;  %920 = vmatprep.subr.bf16.mxu1 %v919_v29  ;;  %v656_v6 = vld [vmem:[%s266_s19 + $0x8] sm:$0xff]  ;;  %v655_v7 = vld [vmem:[%s266_s19] sm:$0xff] }
  0x13   : > { %v270_v20 = vld [vmem:[%s261_s5] sm:$0xff]  ;;  %v271_v21 = vld [vmem:[%s261_s5 + $0x8] sm:$0xff]  ;;  %v272_v22 = vld [vmem:[%s261_s5 + $0x10] sm:$0x3] }
  0x14   : > { %v286_v23 = vrot.slane %v270_v20, 1  ;;  %v287_v24 = vrot.slane %v271_v21, 1  ;;  %v289_v25 = vrot.slane %v272_v22, 1  ;;  %v456_v37 = vrot.slane %v270_v20, 2 }
  0x15   : > { %v457_v38 = vrot.slane %v271_v21, 2  ;;  %922 = vmatpush3.bf16.msra.mxu1 %v919_v29  ;;  %v459_v47 = vrot.slane %v272_v22, 2 }
  0x16   : > { %v288_v26 = vsel %vm285_vm0, %v286_v23, %v287_v24  ;;  %v290_v27 = vsel %vm285_vm0, %v287_v24, %v289_v25  ;;  %924 = vmatprep.subr.bf16.mxu1 %v923_v34 }
  0x17   : > { %827 = vmatprep.mubr.msk.f32.mxu0 %vm291_vm1, %v288_v26  ;;  %v458_v43 = vsel %vm455_vm2, %v456_v37, %v457_v38  ;;  %v460_v51 = vsel %vm455_vm2, %v457_v38, %v459_v47 }
  0x18   : > { %828 = vmatmul.mubr.msk.f32.vlgmr.msra.gmra.mrb[0].mxu0 %vm291_vm1, %v290_v27 }
  0x19   : > { %898 = vmatpush3.bf16.msra.mxu0 %v895_v12  ;;  %838 = vmatprep.mubr.msk.f32.mxu0 %vm291_vm1, %v270_v20 }
  0x1a   : > { %900 = vmatprep.subr.bf16.mxu0 %v899_v28  ;;  %926 = vmatpush3.bf16.msra.mxu1 %v923_v34 }
  0x1b   : > { %928 = vmatprep.subr.bf16.mxu1 %v927_v44 }
  0x1d   : > { %902 = vmatpush3.bf16.msra.mxu0 %v899_v28 }
  0x1e   : > { %904 = vmatprep.subr.bf16.mxu0 %v903_v35  ;;  %930 = vmatpush3.bf16.msra.mxu1 %v927_v44 }
  0x1f   : > { %932 = vmatprep.subr.bf16.mxu1 %v931_v48 }
  0x20   : > { %839 = vmatmul.mubr.msk.f32.vlgmr.msra.gmra.mrb[0].mxu0 %vm291_vm1, %v271_v21 }
  0x21   : > { %906 = vmatpush3.bf16.msra.mxu0 %v903_v35  ;;  %849 = vmatprep.mubr.msk.f32.mxu0 %vm291_vm1, %v458_v43 }
  0x22   : > { %908 = vmatprep.subr.bf16.mxu0 %v907_v42  ;;  %934 = vmatpush3.bf16.msra.mxu1 %v931_v48 }
  0x23   : > { %936 = vmatprep.subr.bf16.mxu1 %v935_v52 }
  0x25   : > { %910 = vmatpush3.bf16.msra.mxu0 %v907_v42 }
  0x26   : > { %938 = vmatpush3.bf16.msra.mxu1 %v935_v52 }
  0x27   : > { %940 = vmatprep.subr.bf16.mxu1 %v939_v55 }
  0x28   : > { %850 = vmatmul.mubr.msk.f32.vlgmr.msra.gmra.mrb[0].mxu0 %vm291_vm1, %v460_v51 }
  0x2a   : > { %942 = vmatpush3.bf16.msra.mxu1 %v939_v55 }
  0xfb   : > { %v851_v57 = vpop.f32.mrb[0].mxu0 }
  0xfc   : > { %v531_v58 = vpop.f32.mrb[1].mxu0  ;;  %v550_v60 = vadd.f32 %v851_v57, %v778_v56 }
  0xfd   : > { %v549_v59 = vadd.f32 %v778_v56, %v531_v58 }
  0xff   : > { %884 = vmatprep.mubr.f32.mxu1 %v549_v59 }
 0x100   : > { %885 = vmatmul.mubr.f32.vlgmr.msra.gmra.mrb[0].mxu1 %v550_v60 }
 0x1d3   : > { %v886_v62 = vpop.f32.mrb[0].mxu1 }
 0x1d4   : > { %v646_v63 = vadd.f32 %v886_v62, %v779_v61  ;;  %v640_v0 = vpop.f32.mrb[1].mxu1 }
 0x1d5   : > { %v641_v1 = vadd.f32 %v779_v61, %v640_v0 }
 0x1d6   : > { %961 = vtanh.f32 %v646_v63 }
 0x1d7   : > { %963 = vtanh.f32 %v641_v1 }
 0x1e0   : > { %v962_v2 = vpop.eup %961 }
 0x1e1   : > { %v964_v3 = vpop.eup %963  ;;  %v653_v4 = vmul.f32 1.442695, %v962_v2 }
 0x1e2   : > { %v651_v5 = vmul.f32 1.442695, %v964_v3 }
 0x1e3   : > { %965 = vpow2.f32 %v653_v4 }
 0x1e4   : > { %967 = vpow2.f32 %v651_v5 }
 0x1ed   : > { %v966_v8 = vpop.eup %965 }
 0x1ee   : > { %v968_v9 = vpop.eup %967  ;;  %v658_v10 = vmul.f32 %v966_v8, %v656_v6 }
 0x1ef   : > { %v657_v11 = vmul.f32 %v968_v9, %v655_v7 }
 0x1f0   : > { %v661_v12 = vsel %vm659_vm3, %v658_v10, 0.0 }
 0x1f1   : > { %v660_v13 = vsel %vm659_vm3, %v657_v11, 0.0 }
 0x1f2   : > { %v662_v14 = vadd.f32 %v661_v12, %v660_v13 }
 0x1f4   : > { %663 = vadd.xlane.f32.xlu0 %v662_v14 }
 0x281   : > { %v664_v16 = vpop.xlane.xlu0 %663 }
 0x282   : > { %v665_v17 = vrot.slane %v664_v16, 4 }
 0x284   : > { %v666_v18 = vadd.f32 %v665_v17, %v664_v16 }
 0x286   : > { %v667_v19 = vrot.slane %v666_v18, 2 }
 0x288   : > { %v668_v20 = vadd.f32 %v667_v19, %v666_v18 }
 0x28a   : > { %v669_v21 = vrot.slane %v668_v20, 1 }
 0x28c   : > { %v670_v22 = vadd.f32 %v669_v21, %v668_v20 }
 0x28e   : > { %948 = vpush %v670_v22 }
 0x2bf   : > { %s949_s20 = spop %948 }
 0x2c0   : > { %s672_s21 = sadd.f32 1e-06, %s949_s20 }
 0x2c2   : > { %v673_v23 = vstv %s672_s21 }
 0x2c3   : > { %969 = vrcp.f32 %v673_v23 }
 0x2cd   : > { %v970_v24 = vpop.eup %969 }
 0x2ce   : > { %v676_v25 = vmul.f32 %v970_v24, %v658_v10  ;;  %v675_v26 = vmul.f32 %v970_v24, %v657_v11 }
 0x2d0   : > { %684 = vperm.xlu1 %960, %v676_v25   ;;  %679 = vperm.xlu0 %959, %v675_v26  }
 0x34f   : > { %v685_v27 = vpop.permute.xlu1 %684  ;;  %v680_v28 = vpop.permute.xlu0 %679 }
 0x350   : > { %v688_v29 = vmul.f32 %v685_v27, %v550_v60  ;;  %v687_v30 = vmul.f32 %v680_v28, %v549_v59 }
 0x352   : > { %v689_v31 = vadd.f32 %v688_v29, %v687_v30 }
 0x354   : > { %v690_v32 = vrot.slane %v689_v31, 4 }
 0x356   : > { %v691_v33 = vadd.f32 %v690_v32, %v689_v31 }
 0x358   : > { %v692_v34 = vrot.slane %v691_v33, 2 }
 0x35a   : > { %v693_v35 = vadd.f32 %v692_v34, %v691_v33 }
 0x35c   : > { %v694_v36 = vrot.slane %v693_v35, 1 }
 0x35e   : > { %v695_v37 = vadd.f32 %v694_v36, %v693_v35 }
 0x360   : > { %696 = vst [vmem:[%s269_s26] sm:$0x1] %v695_v37 }
 0x361 PF: > { %s18_s23 = sadd.s32 1, %s977_s23  }
 0x362   : > { %p15_p4 = scmp.ge.s32.totalorder %s18_s23, 18  }
 0x364   :  { %17 = sbr.rel (!%p15_p4) target bundleno = 3 (0x3), region = 79 }

// kernel: naml_forward.7
= control target key start
LH: loop header
LB: loop body
LE: loop exit
PB: predicated region body
PF: predicated region fallthrough
CT: control target
= control target key end

     0   :  { %s1154_s23 = smov 0   ;;  %s1321_s0 = inlined_call_operand.vmem [shape: f32[16,34,32], index: 0, kind: input, shape index: {}]   ;;  %s1322_s1 = inlined_call_operand.vmem [shape: f32[16,32,1], index: 1, kind: input, shape index: {}]   ;;  %s1323_s2 = inlined_call_operand.vmem [shape: f32[3,32,128], index: 2, kind: input, shape index: {}]   ;;  %s1324_s3 = inlined_call_operand.vmem [shape: f32[1,128], index: 3, kind: input, shape index: {}]   ;;  %s1325_s4 = inlined_call_operand.vmem [shape: f32[128,1], index: 4, kind: input, shape index: {}]   ;;  %s1326_s5 = inlined_call_operand.<no memory space> [shape: f32[1,1], index: 5, kind: input, shape index: {}]   ;;  %s1327_s6 = inlined_call_operand.vmem [shape: f32[16,1,128], index: 6, kind: output, shape index: {}]  }
   0x1   :  { %v11_v0 = vstv %s1326_s5 }
   0x2   :  { %12 = vst [vmem:[#allocation2] sm:$0x1] %v11_v0 }
   0x3 LB: > { %s854_s24 = sadd.s32 4294967295, %s1113_s23   ;;  %p858_p0 = scmp.ge.s32.totalorder %s1113_s23, 1  ;;  %s1113_s23 = sphi %s1154_s23, %s18_s23  }
   0x4   : > { %p224_p1 = scmp.lt.s32.totalorder %s1113_s23, 17 }
   0x6   : > { %p225_p2 = pnand %p858_p0, %p224_p1 }
   0x7   : > { %v862_v1 = vld [vmem:[%s1323_s2 + $0x20] sm:$0xff] (!%p225_p2)  ;;  %v863_v2 = vld [vmem:[%s1323_s2 + $0x28] sm:$0xff] (!%p225_p2)  ;;  %v864_v3 = vld [vmem:[%s1323_s2 + $0x30] sm:$0xff] (!%p225_p2)  ;;  %p257_p3 = scmp.lt.s32.totalorder (!%p225_p2), %s854_s24, 15  ;;  %vm289_vm0 = vcmask (!%p225_p2), 1046528   ;;  %vm299_vm1 = vcmask (!%p225_p2), 261120  }
   0x8   : > { %228 = sbr.rel (%p225_p2) target bundleno = 879 (0x36f), region = 44  ;;  %v1011_v4 = vpack.c.bf16 (!%p225_p2), %v863_v2, %v862_v1  ;;  %v865_v5 = vld [vmem:[%s1323_s2 + $0x38] sm:$0xff] (!%p225_p2)  ;;  %v275_v7 = vld [vmem:[%s1323_s2] sm:$0xff] (!%p225_p2)  ;;  %v276_v8 = vld [vmem:[%s1323_s2 + $0x8] sm:$0xff] (!%p225_p2)  ;;  %vm491_vm2 = vcmask (!%p225_p2), 1045504   ;;  %vm737_vm3 = vcmask (!%p225_p2), 7168  }
   0x9   : > { %v1015_v6 = vpack.c.bf16 (!%p225_p2), %v865_v5, %v864_v3  ;;  %v609_v9 = vld [vmem:[%s1325_s4] sm:$0xff] (!%p225_p2)  ;;  %v610_v10 = vld [vmem:[%s1325_s4 + $0x8] sm:$0xff] (!%p225_p2)  ;;  %v611_v11 = vld [vmem:[%s1325_s4 + $0x10] sm:$0xff] (!%p225_p2)  ;;  %v1019_v12 = vpack.c.bf16 (!%p225_p2), %v276_v8, %v275_v7 }
   0xa   : > { %1012 = vmatprep.subr.bf16.mxu0 (!%p225_p2), %v1011_v4  ;;  %v277_v13 = vld [vmem:[%s1323_s2 + $0x10] sm:$0xff] (!%p225_p2)  ;;  %v1035_v14 = vpack.c.bf16 (!%p225_p2), %v610_v10, %v609_v9  ;;  %v612_v15 = vld [vmem:[%s1325_s4 + $0x18] sm:$0xff] (!%p225_p2)  ;;  %v613_v18 = vld [vmem:[%s1325_s4 + $0x20] sm:$0xff] (!%p225_p2) }
   0xb   : > { %1014 = vmatpush3.bf16.msra.mxu0 (!%p225_p2), %v1011_v4  ;;  %v278_v16 = vld [vmem:[%s1323_s2 + $0x18] sm:$0xff] (!%p225_p2)  ;;  %v1039_v17 = vpack.c.bf16 (!%p225_p2), %v612_v15, %v611_v11  ;;  %v614_v19 = vld [vmem:[%s1325_s4 + $0x28] sm:$0xff] (!%p225_p2)  ;;  %v874_v33 = vld [vmem:[%s1323_s2 + $0x40] sm:$0xff] (!%p225_p2) }
   0xc   : > { %1016 = vmatprep.subr.bf16.mxu0 (!%p225_p2), %v1015_v6  ;;  %1036 = vmatprep.subr.bf16.mxu1 (!%p225_p2), %v1035_v14  ;;  %v1023_v28 = vpack.c.bf16 (!%p225_p2), %v278_v16, %v277_v13  ;;  %v1043_v34 = vpack.c.bf16 (!%p225_p2), %v614_v19, %v613_v18  ;;  %v875_v36 = vld [vmem:[%s1323_s2 + $0x48] sm:$0xff] (!%p225_p2)  ;;  %v615_v37 = vld [vmem:[%s1325_s4 + $0x30] sm:$0xff] (!%p225_p2)  ;;  %v616_v38 = vld [vmem:[%s1325_s4 + $0x38] sm:$0xff] (!%p225_p2) }
   0xd   : > { %1038 = vmatpush3.bf16.msra.mxu1 (!%p225_p2), %v1035_v14  ;;  %v1027_v40 = vpack.c.bf16 (!%p225_p2), %v875_v36, %v874_v33  ;;  %v876_v41 = vld [vmem:[%s1323_s2 + $0x50] sm:$0xff] (!%p225_p2)  ;;  %v1047_v42 = vpack.c.bf16 (!%p225_p2), %v616_v38, %v615_v37  ;;  %v877_v43 = vld [vmem:[%s1323_s2 + $0x58] sm:$0xff] (!%p225_p2)  ;;  %v617_v44 = vld [vmem:[%s1325_s4 + $0x40] sm:$0xff] (!%p225_p2) }
   0xe   : > { %1040 = vmatprep.subr.bf16.mxu1 (!%p225_p2), %v1039_v17  ;;  %v618_v45 = vld [vmem:[%s1325_s4 + $0x48] sm:$0xff] (!%p225_p2)  ;;  %v1031_v46 = vpack.c.bf16 (!%p225_p2), %v877_v43, %v876_v41  ;;  %v619_v50 = vld [vmem:[%s1325_s4 + $0x50] sm:$0xff] (!%p225_p2)  ;;  %v620_v51 = vld [vmem:[%s1325_s4 + $0x58] sm:$0xff] (!%p225_p2) }
   0xf   : > { %s1329_s24 = smov (!%p257_p3, %s854_s24), 15  ;;  %1018 = vmatpush3.bf16.msra.mxu0 %v1015_v6  ;;  %v1051_v49 = vpack.c.bf16 %v618_v45, %v617_v44  ;;  %v1055_v55 = vpack.c.bf16 %v620_v51, %v619_v50  ;;  %v621_v56 = vld [vmem:[%s1325_s4 + $0x60] sm:$0xff]  ;;  %v622_v57 = vld [vmem:[%s1325_s4 + $0x68] sm:$0xff]  ;;  %v623_v63 = vld [vmem:[%s1325_s4 + $0x70] sm:$0xff] }
  0x10   : > { %s1075_s12 = smul.u32 40, %s1329_s24  ;;  %1020 = vmatprep.subr.bf16.mxu0 %v1019_v12  ;;  %v1059_v60 = vpack.c.bf16 %v622_v57, %v621_v56  ;;  %v624_v0 = vld [vmem:[%s1325_s4 + $0x78] sm:$0xff]  ;;  %v882_v2 = vld [vmem:[%s1324_s3] ss:$0 sm:$0xff]  ;;  %s886_s16 = sshll.u32 %s1329_s24, 5 }
  0x11   : > { %1042 = vmatpush3.bf16.msra.mxu1 %v1039_v17  ;;  %v1063_v1 = vpack.c.bf16 %v624_v0, %v623_v63  ;;  %v883_v11 = vld [vmem:[#allocation2] ss:$0 sm:$0xff]  ;;  %s266_s19 = scalar_lea.vmem %s1322_s1, %s886_s16  ;;  %s269_s26 = scalar_lea.vmem %s1327_s6, %s1329_s24 }
  0x12   : > { %s261_s5 = scalar_lea.vmem %s1321_s0, %s1075_s12  ;;  %1044 = vmatprep.subr.bf16.mxu1 %v1043_v34 }
  0x13   : > { %v270_v20 = vld [vmem:[%s261_s5] sm:$0xff]  ;;  %v1210_v21 = vld [vmem:[%s261_s5 + $0x8] sm:$0xff]  ;;  %v1212_v22 = vld [vmem:[%s261_s5 + $0x10] sm:$0xff] }
  0x14   : > { %v290_v23 = vrot.slane %v270_v20, 1  ;;  %v291_v24 = vrot.slane %v1210_v21, 1  ;;  %v293_v25 = vrot.slane %v1212_v22, 1  ;;  %v1216_v26 = vld [vmem:[%s261_s5 + $0x18] sm:$0xff]  ;;  %v1219_v29 = vld [vmem:[%s261_s5 + $0x20] sm:$0x3] }
  0x15   : > { %v295_v27 = vrot.slane %v1216_v26, 1  ;;  %v297_v32 = vrot.slane %v1219_v29, 1  ;;  %1046 = vmatpush3.bf16.msra.mxu1 %v1043_v34  ;;  %v492_v47 = vrot.slane %v270_v20, 2  ;;  %v493_v48 = vrot.slane %v1210_v21, 2  ;;  %v731_v34 = vld [vmem:[%s266_s19 + $0x10] sm:$0xff] }
  0x16   : > { %v292_v30 = vsel %vm289_vm0, %v290_v23, %v291_v24  ;;  %v294_v31 = vsel %vm289_vm0, %v291_v24, %v293_v25  ;;  %1048 = vmatprep.subr.bf16.mxu1 %v1047_v42  ;;  %v495_v52 = vrot.slane %v1212_v22, 2  ;;  %v497_v54 = vrot.slane %v1216_v26, 2 }
  0x17   : > { %939 = vmatprep.mubr.msk.f32.mxu0 %vm299_vm1, %v292_v30  ;;  %v296_v35 = vsel %vm289_vm0, %v293_v25, %v295_v27  ;;  %v298_v39 = vsel %vm289_vm0, %v295_v27, %v297_v32  ;;  %v494_v53 = vsel %vm491_vm2, %v492_v47, %v493_v48  ;;  %v499_v59 = vrot.slane %v1219_v29, 2  ;;  %v729_v29 = vld [vmem:[%s266_s19] sm:$0xff] }
  0x18   : > { %940 = vmatmul.mubr.msk.f32.vlgmr.msra.gmra.mrb[0].mxu0 %vm299_vm1, %v294_v31  ;;  %v496_v58 = vsel %vm491_vm2, %v493_v48, %v495_v52  ;;  %v498_v61 = vsel %vm491_vm2, %v495_v52, %v497_v54  ;;  %v1115_v47 = vmov 0  }
  0x19   : > { %1022 = vmatpush3.bf16.msra.mxu0 %v1019_v12  ;;  %942 = vmatprep.mubr.msk.f32.mxu0 %vm299_vm1, %v296_v35  ;;  %v500_v62 = vsel %vm491_vm2, %v497_v54, %v499_v59  ;;  %v732_v35 = vld [vmem:[%s266_s19 + $0x18] sm:$0xff] }
  0x1a   : > { %1024 = vmatprep.subr.bf16.mxu0 %v1023_v28  ;;  %1050 = vmatpush3.bf16.msra.mxu1 %v1047_v42 }
  0x1b   : > { %1052 = vmatprep.subr.bf16.mxu1 %v1051_v49  ;;  %1088 = vset.pattern.permute.xlu1 %v1115_v47 }
  0x1c   : > { %943 = vmatmul.mubr.msk.f32.gmra.mrb[2].mxu0 %vm299_vm1, %v298_v39  ;;  %1087 = vset.pattern.permute.xlu0 %v1115_v47 }
  0x1d   : > { %1026 = vmatpush3.bf16.msra.mxu0 %v1023_v28  ;;  %953 = vmatprep.mubr.msk.f32.mxu0 %vm299_vm1, %v270_v20  ;;  %v730_v28 = vld [vmem:[%s266_s19 + $0x8] sm:$0xff] }
  0x1e   : > { %1028 = vmatprep.subr.bf16.mxu0 %v1027_v40  ;;  %1054 = vmatpush3.bf16.msra.mxu1 %v1051_v49 }
  0x1f   : > { %1056 = vmatprep.subr.bf16.mxu1 %v1055_v55 }
  0x20   : > { %954 = vmatmul.mubr.msk.f32.vlgmr.msra.gmra.mrb[0].mxu0 %vm299_vm1, %v1210_v21 }
  0x21   : > { %1030 = vmatpush3.bf16.msra.mxu0 %v1027_v40  ;;  %956 = vmatprep.mubr.msk.f32.mxu0 %vm299_vm1, %v1212_v22 }
  0x22   : > { %1032 = vmatprep.subr.bf16.mxu0 %v1031_v46  ;;  %1058 = vmatpush3.bf16.msra.mxu1 %v1055_v55 }
  0x23   : > { %1060 = vmatprep.subr.bf16.mxu1 %v1059_v60 }
  0x24   : > { %957 = vmatmul.mubr.msk.f32.gmra.mrb[2].mxu0 %vm299_vm1, %v1216_v26 }
  0x25   : > { %1034 = vmatpush3.bf16.msra.mxu0 %v1031_v46  ;;  %967 = vmatprep.mubr.msk.f32.mxu0 %vm299_vm1, %v494_v53 }
  0x26   : > { %1062 = vmatpush3.bf16.msra.mxu1 %v1059_v60 }
  0x27   : > { %1064 = vmatprep.subr.bf16.mxu1 %v1063_v1 }
  0x28   : > { %968 = vmatmul.mubr.msk.f32.vlgmr.msra.gmra.mrb[0].mxu0 %vm299_vm1, %v496_v58 }
  0x29   : > { %970 = vmatprep.mubr.msk.f32.mxu0 %vm299_vm1, %v498_v61 }
  0x2a   : > { %1066 = vmatpush3.bf16.msra.mxu1 %v1063_v1 }
  0x2c   : > { %971 = vmatmul.mubr.msk.f32.gmra.mrb[2].mxu0 %vm299_vm1, %v500_v62 }
  0xfb   : > { %v969_v3 = vpop.f32.mrb[0].mxu0 }
  0xfc   : > { %v575_v4 = vpop.f32.mrb[1].mxu0  ;;  %v1296_v6 = vadd.f32 %v969_v3, %v882_v2 }
  0xfd   : > { %v1294_v5 = vadd.f32 %v882_v2, %v575_v4 }
  0xff   : > { %v972_v7 = vpop.f32.mrb[2].mxu0  ;;  %1005 = vmatprep.mubr.f32.mxu1 %v1294_v5 }
 0x100   : > { %v585_v8 = vpop.f32.mrb[3].mxu0  ;;  %1006 = vmatmul.mubr.f32.vlgmr.msra.gmra.mrb[0].mxu1 %v1296_v6  ;;  %v1302_v10 = vadd.f32 %v972_v7, %v882_v2 }
 0x101   : > { %v1300_v9 = vadd.f32 %v882_v2, %v585_v8 }
 0x103   : > { %1008 = vmatprep.mubr.f32.mxu1 %v1300_v9 }
 0x104   : > { %1009 = vmatmul.mubr.f32.gmra.mrb[2].mxu1 %v1302_v10 }
 0x1d3   : > { %v1007_v12 = vpop.f32.mrb[0].mxu1 }
 0x1d4   : > { %v704_v13 = vadd.f32 %v1007_v12, %v883_v11  ;;  %v698_v14 = vpop.f32.mrb[1].mxu1 }
 0x1d5   : > { %v699_v15 = vadd.f32 %v883_v11, %v698_v14 }
 0x1d6   : > { %1089 = vtanh.f32 %v704_v13 }
 0x1d7   : > { %1091 = vtanh.f32 %v699_v15  ;;  %v1010_v16 = vpop.f32.mrb[2].mxu1 }
 0x1d8   : > { %v714_v17 = vadd.f32 %v1010_v16, %v883_v11  ;;  %v708_v18 = vpop.f32.mrb[3].mxu1 }
 0x1d9   : > { %v709_v19 = vadd.f32 %v883_v11, %v708_v18 }
 0x1da   : > { %1093 = vtanh.f32 %v714_v17 }
 0x1db   : > { %1095 = vtanh.f32 %v709_v19 }
 0x1e0   : > { %v1090_v20 = vpop.eup %1089 }
 0x1e1   : > { %v1092_v21 = vpop.eup %1091  ;;  %v723_v22 = vmul.f32 1.442695, %v1090_v20 }
 0x1e2   : > { %v721_v23 = vmul.f32 1.442695, %v1092_v21 }
 0x1e3   : > { %1097 = vpow2.f32 %v723_v22 }
 0x1e4   : > { %v1094_v24 = vpop.eup %1093  ;;  %1099 = vpow2.f32 %v721_v23 }
 0x1e5   : > { %v1096_v25 = vpop.eup %1095  ;;  %v727_v26 = vmul.f32 1.442695, %v1094_v24 }
 0x1e6   : > { %v725_v27 = vmul.f32 1.442695, %v1096_v25 }
 0x1e7   : > { %1101 = vpow2.f32 %v727_v26 }
 0x1e8   : > { %1103 = vpow2.f32 %v725_v27 }
 0x1ed   : > { %v1098_v30 = vpop.eup %1097 }
 0x1ee   : > { %v1100_v31 = vpop.eup %1099  ;;  %v734_v32 = vmul.f32 %v1098_v30, %v730_v28 }
 0x1ef   : > { %v733_v33 = vmul.f32 %v1100_v31, %v729_v29 }
 0x1f0   : > { %v739_v38 = vsel %vm737_vm3, %v734_v32, 0.0 }
 0x1f1   : > { %v1102_v36 = vpop.eup %1101  ;;  %v738_v37 = vsel %vm737_vm3, %v733_v33, 0.0 }
 0x1f2   : > { %v1104_v39 = vpop.eup %1103  ;;  %v736_v41 = vmul.f32 %v1102_v36, %v732_v35  ;;  %v740_v42 = vadd.f32 %v739_v38, %v738_v37 }
 0x1f3   : > { %v735_v40 = vmul.f32 %v1104_v39, %v731_v34 }
 0x1f4   : > { %v743_v45 = vsel %vm737_vm3, %v736_v41, 0.0 }
 0x1f5   : > { %v741_v43 = vsel %vm737_vm3, %v735_v40, 0.0 }
 0x1f6   : > { %v742_v44 = vadd.f32 %v741_v43, %v740_v42 }
 0x1f8   : > { %v744_v46 = vadd.f32 %v743_v45, %v742_v44 }
 0x1fa   : > { %745 = vadd.xlane.f32.xlu0 %v744_v46 }
 0x287   : > { %v746_v48 = vpop.xlane.xlu0 %745 }
 0x288   : > { %v747_v49 = vrot.slane %v746_v48, 4 }
 0x28a   : > { %v748_v50 = vadd.f32 %v747_v49, %v746_v48 }
 0x28c   : > { %v749_v51 = vrot.slane %v748_v50, 2 }
 0x28e   : > { %v750_v52 = vadd.f32 %v749_v51, %v748_v50 }
 0x290   : > { %v751_v53 = vrot.slane %v750_v52, 1 }
 0x292   : > { %v752_v54 = vadd.f32 %v751_v53, %v750_v52 }
 0x294   : > { %1076 = vpush %v752_v54 }
 0x2c5   : > { %s1077_s20 = spop %1076 }
 0x2c6   : > { %s754_s21 = sadd.f32 1e-06, %s1077_s20 }
 0x2c8   : > { %v755_v55 = vstv %s754_s21 }
 0x2c9   : > { %1105 = vrcp.f32 %v755_v55 }
 0x2d3   : > { %v1106_v56 = vpop.eup %1105 }
 0x2d4   : > { %v758_v57 = vmul.f32 %v1106_v56, %v734_v32  ;;  %v757_v58 = vmul.f32 %v1106_v56, %v733_v33  ;;  %v759_v59 = vmul.f32 %v1106_v56, %v735_v40  ;;  %v760_v60 = vmul.f32 %v1106_v56, %v736_v41 }
 0x2d6   : > { %768 = vperm.xlu1 %1088, %v758_v57   ;;  %763 = vperm.xlu0 %1087, %v757_v58  }
 0x2da   : > { %773 = vperm.xlu1 %1088, %v759_v59  }
 0x2de   : > { %778 = vperm.xlu1 %1088, %v760_v60  }
 0x355   : > { %v769_v61 = vpop.permute.xlu1 %768  ;;  %v764_v62 = vpop.permute.xlu0 %763 }
 0x356   : > { %v782_v63 = vmul.f32 %v769_v61, %v1296_v6  ;;  %v781_v0 = vmul.f32 %v764_v62, %v1294_v5 }
 0x358   : > { %v785_v3 = vadd.f32 %v782_v63, %v781_v0 }
 0x359   : > { %v774_v1 = vpop.permute.xlu1 %773 }
 0x35a   : > { %v783_v2 = vmul.f32 %v774_v1, %v1300_v9 }
 0x35c   : > { %v786_v7 = vadd.f32 %v785_v3, %v783_v2 }
 0x35d   : > { %v779_v4 = vpop.permute.xlu1 %778 }
 0x35e   : > { %v784_v8 = vmul.f32 %v779_v4, %v1302_v10 }
 0x360   : > { %v787_v11 = vadd.f32 %v786_v7, %v784_v8 }
 0x362   : > { %v788_v12 = vrot.slane %v787_v11, 4 }
 0x364   : > { %v789_v13 = vadd.f32 %v788_v12, %v787_v11 }
 0x366   : > { %v790_v14 = vrot.slane %v789_v13, 2 }
 0x368   : > { %v791_v15 = vadd.f32 %v790_v14, %v789_v13 }
 0x36a   : > { %v792_v16 = vrot.slane %v791_v15, 1 }
 0x36c   : > { %v793_v6 = vadd.f32 %v792_v16, %v791_v15 }
 0x36e   : > { %794 = vst [vmem:[%s269_s26] sm:$0x1] %v793_v6 }
 0x36f PF: > { %s18_s23 = sadd.s32 1, %s1113_s23  }
 0x370   : > { %p15_p4 = scmp.ge.s32.totalorder %s18_s23, 18  }
 0x372   :  { %17 = sbr.rel (!%p15_p4) target bundleno = 3 (0x3), region = 79 }

// kernel: naml_forward.8
= control target key start
LH: loop header
LB: loop body
LE: loop exit
PB: predicated region body
PF: predicated region fallthrough
CT: control target
= control target key end

     0   :  { %s230_s0 = inlined_call_operand.vmem [shape: s32[16], index: 0, kind: input, shape index: {}]   ;;  %s231_s1 = inlined_call_operand.vmem [shape: f32[16,1,128], index: 1, kind: input, shape index: {}]   ;;  %s232_s2 = inlined_call_operand.vmem [shape: f32[16,1,128], index: 2, kind: output, shape index: {}]  }
   0x1   :  { %s7_s11 = sshll.u32 %s230_s0, 4  ;;  %s8_s11 = int_to_ptr.vmem [resolvable:$true] %s7_s11 }
   0x2   :  { %s183_s12 = scalar_lea.vmem %s8_s11, 16  ;;  %p188_p1 = scmp.lt.s32.totalorder %s8_s11, %s8_s11 }
   0x3   :  { %p184_p0 = scmp.ne.s32.totalorder %s8_s11, %s183_s12  ;;  %p189_p2 = scmp.lt.s32.totalorder %s183_s12, %s183_s12 }
   0x5   :  { %p190_p3 = por %p189_p2, %p188_p1 }
   0x7   :  { %p191_p4 = pnand %p190_p3, %p184_p0 }
   0x9   :  { %194 = shalt.err (!%p191_p4)  }
   0xa   :  { %s205_s13 = smov [#allocation3]  }
   0xb   :  { %10 = dma.vmem_to_smem %s8_s11, 16, %s205_s13, [#allocation2] }
   0xc   :  { %199 = dma.done.wait [#allocation2], 16 }
   0xd   :  { %200 = vsyncadd [#allocation2], 4294967280 }
   0xe   :  { %12 = sfence }
   0xf   :  { %s201_s14 = smov 0  }
  0x10 LB: > { %s167_s15 = sadd.s32 4294967295, %s203_s14   ;;  %p171_p5 = scmp.ge.s32.totalorder %s203_s14, 1  ;;  %s203_s14 = sphi %s201_s14, %s18_s14  }
  0x11   : > { %p96_p6 = scmp.lt.s32.totalorder %s203_s14, 17 }
  0x13   : > { %p97_p7 = pnand %p171_p5, %p96_p6 }
  0x14   : > { %s113_s0 = sld [smem:[#allocation3 + %s167_s15]] (!%p97_p7)  ;;  %p118_p8 = scmp.lt.s32.totalorder (!%p97_p7), %s167_s15, 15 }
  0x15   : > { %100 = sbr.rel (%p97_p7) target bundleno = 32 (0x20), region = 24 }
  0x1a   : > { %p114_p9 = scmp.lt.s32.totalorder (!%p97_p7), %s113_s0, 15 }
  0x1c   : > { %s234_s15 = smov (!%p118_p8, %s167_s15), 15  ;;  %s236_s0 = smov (!%p114_p9, %s113_s0), 15 }
  0x1d   : > { %s120_s18 = scalar_lea.vmem %s232_s2, %s234_s15  ;;  %s116_s21 = scalar_lea.vmem %s231_s1, %s236_s0 }
  0x1e   : > { %v121_v0 = vld [vmem:[%s116_s21] sm:$0x1] }
  0x1f   : > { %122 = vst [vmem:[%s120_s18] sm:$0x1] %v121_v0 }
  0x20 PF: > { %s18_s14 = sadd.s32 1, %s203_s14  }
  0x21   : > { %p15_p10 = scmp.ge.s32.totalorder %s18_s14, 18  }
  0x23   :  { %17 = sbr.rel (!%p15_p10) target bundleno = 16 (0x10), region = 54 }

// kernel: naml_forward.10
= control target key start
LH: loop header
LB: loop body
LE: loop exit
PB: predicated region body
PF: predicated region fallthrough
CT: control target
= control target key end

     0   :  { %s481_s14 = smov 0   ;;  %s554_s0 = inlined_call_operand.vmem [shape: f32[16,4,128], index: 0, kind: input, shape index: {}]   ;;  %s555_s1 = inlined_call_operand.vmem [shape: f32[128,1], index: 1, kind: input, shape index: {}]   ;;  %s556_s2 = inlined_call_operand.<no memory space> [shape: f32[1,1], index: 2, kind: input, shape index: {}]   ;;  %s557_s3 = inlined_call_operand.vmem [shape: f32[16,1,128], index: 3, kind: output, shape index: {}]  }
   0x1   :  { %v8_v0 = vstv %s556_s2 }
   0x2   :  { %9 = vst [vmem:[#allocation2] sm:$0x1] %v8_v0 }
   0x3 LB: > { %s340_s15 = sadd.s32 4294967295, %s452_s14   ;;  %p344_p0 = scmp.ge.s32.totalorder %s452_s14, 1  ;;  %s452_s14 = sphi %s481_s14, %s15_s14  }
   0x4   : > { %p138_p1 = scmp.lt.s32.totalorder %s452_s14, 17 }
   0x6   : > { %p139_p2 = pnand %p344_p0, %p138_p1 }
   0x7   : > { %v167_v1 = vld [vmem:[%s555_s1] sm:$0xff] (!%p139_p2)  ;;  %v168_v2 = vld [vmem:[%s555_s1 + $0x8] sm:$0xff] (!%p139_p2)  ;;  %v169_v3 = vld [vmem:[%s555_s1 + $0x10] sm:$0xff] (!%p139_p2)  ;;  %v454_v4 = vmov (!%p139_p2), 0.0|0.0   ;;  %vm455_vm0 = vmmov (!%p139_p2), 0   ;;  %v456_v7 = vmov (!%p139_p2), 0.0  }
   0x8   : > { %142 = sbr.rel (%p139_p2) target bundleno = 644 (0x284), region = 32  ;;  %401 = vmatprep.subr.bf16.mxu0 (!%p139_p2), %v454_v4  ;;  %v402_v5 = vpack.c.bf16 (!%p139_p2), %v168_v2, %v167_v1  ;;  %v170_v6 = vld [vmem:[%s555_s1 + $0x18] sm:$0xff] (!%p139_p2)  ;;  %398 = vmatprep.mubr.msk.f32.mxu0 (!%p139_p2), %vm455_vm0, %v456_v7  ;;  %v171_v9 = vld [vmem:[%s555_s1 + $0x20] sm:$0xff] (!%p139_p2)  ;;  %v172_v10 = vld [vmem:[%s555_s1 + $0x28] sm:$0xff] (!%p139_p2)  ;;  %p159_p3 = scmp.lt.s32.totalorder (!%p139_p2), %s340_s15, 15  ;;  %vm263_vm1 = vcmask (!%p139_p2), 3072  }
   0x9   : > { %v405_v8 = vpack.c.bf16 (!%p139_p2), %v170_v6, %v169_v3  ;;  %v408_v11 = vpack.c.bf16 (!%p139_p2), %v172_v10, %v171_v9  ;;  %v173_v12 = vld [vmem:[%s555_s1 + $0x30] sm:$0xff] (!%p139_p2)  ;;  %v174_v13 = vld [vmem:[%s555_s1 + $0x38] sm:$0xff] (!%p139_p2)  ;;  %v175_v15 = vld [vmem:[%s555_s1 + $0x40] sm:$0xff] (!%p139_p2)  ;;  %v457_v36 = vmov (!%p139_p2), 0   ;;  %vm284_vm2 = vcmask (!%p139_p2), 1043456  }
   0xa   : > { %403 = vmatpush3.bf16.msra.mxu0 (!%p139_p2), %v402_v5  ;;  %v411_v14 = vpack.c.bf16 (!%p139_p2), %v174_v13, %v173_v12  ;;  %v176_v16 = vld [vmem:[%s555_s1 + $0x48] sm:$0xff] (!%p139_p2)  ;;  %v177_v18 = vld [vmem:[%s555_s1 + $0x50] sm:$0xff] (!%p139_p2)  ;;  %v178_v19 = vld [vmem:[%s555_s1 + $0x58] sm:$0xff] (!%p139_p2)  ;;  %439 = vset.pattern.permute.xlu0 (!%p139_p2), %v457_v36 }
   0xb   : > { %404 = vmatprep.subr.bf16.mxu0 (!%p139_p2), %v454_v4  ;;  %v414_v17 = vpack.c.bf16 (!%p139_p2), %v176_v16, %v175_v15  ;;  %v417_v20 = vpack.c.bf16 (!%p139_p2), %v178_v19, %v177_v18  ;;  %v179_v21 = vld [vmem:[%s555_s1 + $0x60] sm:$0xff] (!%p139_p2)  ;;  %v180_v22 = vld [vmem:[%s555_s1 + $0x68] sm:$0xff] (!%p139_p2)  ;;  %v181_v24 = vld [vmem:[%s555_s1 + $0x70] sm:$0xff] (!%p139_p2) }
   0xc   : > { %v420_v23 = vpack.c.bf16 (!%p139_p2), %v180_v22, %v179_v21  ;;  %v182_v25 = vld [vmem:[%s555_s1 + $0x78] sm:$0xff] (!%p139_p2)  ;;  %v346_v28 = vld [vmem:[#allocation2] ss:$0 sm:$0xff] (!%p139_p2) }
   0xd   : > { %v423_v26 = vpack.c.bf16 (!%p139_p2), %v182_v25, %v181_v24 }
   0xe   : > { %406 = vmatpush3.bf16.msra.mxu0 (!%p139_p2), %v405_v8 }
   0xf   : > { %407 = vmatprep.subr.bf16.mxu0 %v454_v4  ;;  %s559_s15 = smov (!%p159_p3, %s340_s15), 15 }
  0x10   : > { %s345_s21 = sshll.u32 %s559_s15, 2  ;;  %s165_s29 = scalar_lea.vmem %s557_s3, %s559_s15 }
  0x11   : > { %s162_s24 = scalar_lea.vmem %s554_s0, %s345_s21 }
  0x12   : > { %409 = vmatpush3.bf16.msra.mxu0 %v408_v11  ;;  %v166_v27 = vld [vmem:[%s162_s24] sm:$0xf] }
  0x13   : > { %410 = vmatprep.subr.bf16.mxu0 %v454_v4 }
  0x16   : > { %412 = vmatpush3.bf16.msra.mxu0 %v411_v14 }
  0x17   : > { %413 = vmatprep.subr.bf16.mxu0 %v454_v4 }
  0x1a   : > { %415 = vmatpush3.bf16.msra.mxu0 %v414_v17 }
  0x1b   : > { %416 = vmatprep.subr.bf16.mxu0 %v454_v4 }
  0x1e   : > { %418 = vmatpush3.bf16.msra.mxu0 %v417_v20 }
  0x1f   : > { %419 = vmatprep.subr.bf16.mxu0 %v454_v4 }
  0x22   : > { %421 = vmatpush3.bf16.msra.mxu0 %v420_v23 }
  0x23   : > { %422 = vmatprep.subr.bf16.mxu0 %v454_v4 }
  0x26   : > { %424 = vmatpush3.bf16.msra.mxu0 %v423_v26 }
  0x29   : > { %399 = vmatmul.mubr.f32.vlgmr.msra.gmra.mrb[0].mxu0 %v166_v27 }
  0xfc   : > { %v256_v29 = vpop.f32.mrb[0].mxu0 }
  0xfd   : > { %v257_v30 = vadd.f32 %v346_v28, %v256_v29  ;;  %v400_v31 = vpop.f32.mrb[1].mxu0 }
  0xff   : > { %440 = vtanh.f32 %v257_v30 }
 0x109   : > { %v441_v32 = vpop.eup %440 }
 0x10a   : > { %v261_v33 = vmul.f32 1.442695, %v441_v32 }
 0x10c   : > { %442 = vpow2.f32 %v261_v33 }
 0x116   : > { %v443_v34 = vpop.eup %442 }
 0x117   : > { %v264_v35 = vsel %vm263_vm1, %v443_v34, 0.0 }
 0x118   : > { %265 = vadd.xlane.f32.xlu0 %v264_v35 }
 0x1a5   : > { %v266_v37 = vpop.xlane.xlu0 %265 }
 0x1a6   : > { %v267_v38 = vrot.slane %v266_v37, 4 }
 0x1a8   : > { %v268_v39 = vadd.f32 %v267_v38, %v266_v37 }
 0x1aa   : > { %v269_v40 = vrot.slane %v268_v39, 2 }
 0x1ac   : > { %v270_v41 = vadd.f32 %v269_v40, %v268_v39 }
 0x1ae   : > { %v271_v42 = vrot.slane %v270_v41, 1 }
 0x1b0   : > { %v272_v43 = vadd.f32 %v271_v42, %v270_v41 }
 0x1b2   : > { %425 = vpush %v272_v43 }
 0x1e3   : > { %s426_s25 = spop %425 }
 0x1e4   : > { %s274_s26 = sadd.f32 1e-06, %s426_s25 }
 0x1e6   : > { %v275_v44 = vstv %s274_s26 }
 0x1e7   : > { %444 = vrcp.f32 %v275_v44 }
 0x1f1   : > { %v445_v45 = vpop.eup %444 }
 0x1f2   : > { %v277_v46 = vmul.f32 %v445_v45, %v443_v34 }
 0x1f4   : > { %280 = vperm.xlu0 %439, %v277_v46  }
 0x273   : > { %v281_v47 = vpop.permute.xlu0 %280 }
 0x274   : > { %v283_v48 = vmul.f32 %v281_v47, %v166_v27 }
 0x276   : > { %v285_v49 = vsel %vm284_vm2, %v283_v48, 0.0 }
 0x277   : > { %v286_v50 = vrot.slane %v285_v49, 4 }
 0x279   : > { %v287_v51 = vadd.f32 %v286_v50, %v285_v49 }
 0x27b   : > { %v288_v52 = vrot.slane %v287_v51, 2 }
 0x27d   : > { %v289_v53 = vadd.f32 %v288_v52, %v287_v51 }
 0x27f   : > { %v290_v54 = vrot.slane %v289_v53, 1 }
 0x281   : > { %v291_v55 = vadd.f32 %v290_v54, %v289_v53 }
 0x283   : > { %292 = vst [vmem:[%s165_s29] sm:$0x1] %v291_v55 }
 0x284 PF: > { %s15_s14 = sadd.s32 1, %s452_s14  }
 0x285   : > { %p12_p4 = scmp.ge.s32.totalorder %s15_s14, 18  }
 0x287   :  { %14 = sbr.rel (!%p12_p4) target bundleno = 3 (0x3), region = 62 }

// kernel: naml_forward.11
= control target key start
LH: loop header
LB: loop body
LE: loop exit
PB: predicated region body
PF: predicated region fallthrough
CT: control target
= control target key end

     0   :  { %s481_s14 = smov 0   ;;  %s554_s0 = inlined_call_operand.vmem [shape: f32[2,4,128], index: 0, kind: input, shape index: {}]   ;;  %s555_s1 = inlined_call_operand.vmem [shape: f32[128,1], index: 1, kind: input, shape index: {}]   ;;  %s556_s2 = inlined_call_operand.<no memory space> [shape: f32[1,1], index: 2, kind: input, shape index: {}]   ;;  %s557_s3 = inlined_call_operand.vmem [shape: f32[2,1,128], index: 3, kind: output, shape index: {}]  }
   0x1   :  { %v8_v0 = vstv %s556_s2 }
   0x2   :  { %9 = vst [vmem:[#allocation2] sm:$0x1] %v8_v0 }
   0x3 LB: > { %s340_s15 = sadd.s32 4294967295, %s452_s14   ;;  %p344_p0 = scmp.ge.s32.totalorder %s452_s14, 1  ;;  %s452_s14 = sphi %s481_s14, %s15_s14  }
   0x4   : > { %p138_p1 = scmp.lt.s32.totalorder %s452_s14, 3 }
   0x6   : > { %p139_p2 = pnand %p344_p0, %p138_p1 }
   0x7   : > { %v167_v1 = vld [vmem:[%s555_s1] sm:$0xff] (!%p139_p2)  ;;  %v168_v2 = vld [vmem:[%s555_s1 + $0x8] sm:$0xff] (!%p139_p2)  ;;  %v169_v3 = vld [vmem:[%s555_s1 + $0x10] sm:$0xff] (!%p139_p2)  ;;  %v454_v4 = vmov (!%p139_p2), 0.0|0.0   ;;  %vm455_vm0 = vmmov (!%p139_p2), 0   ;;  %v456_v7 = vmov (!%p139_p2), 0.0  }
   0x8   : > { %142 = sbr.rel (%p139_p2) target bundleno = 644 (0x284), region = 32  ;;  %401 = vmatprep.subr.bf16.mxu0 (!%p139_p2), %v454_v4  ;;  %v402_v5 = vpack.c.bf16 (!%p139_p2), %v168_v2, %v167_v1  ;;  %v170_v6 = vld [vmem:[%s555_s1 + $0x18] sm:$0xff] (!%p139_p2)  ;;  %398 = vmatprep.mubr.msk.f32.mxu0 (!%p139_p2), %vm455_vm0, %v456_v7  ;;  %v171_v9 = vld [vmem:[%s555_s1 + $0x20] sm:$0xff] (!%p139_p2)  ;;  %v172_v10 = vld [vmem:[%s555_s1 + $0x28] sm:$0xff] (!%p139_p2)  ;;  %p159_p3 = scmp.lt.s32.totalorder (!%p139_p2), %s340_s15, 1  ;;  %vm263_vm1 = vcmask (!%p139_p2), 3072  }
   0x9   : > { %v405_v8 = vpack.c.bf16 (!%p139_p2), %v170_v6, %v169_v3  ;;  %v408_v11 = vpack.c.bf16 (!%p139_p2), %v172_v10, %v171_v9  ;;  %v173_v12 = vld [vmem:[%s555_s1 + $0x30] sm:$0xff] (!%p139_p2)  ;;  %v174_v13 = vld [vmem:[%s555_s1 + $0x38] sm:$0xff] (!%p139_p2)  ;;  %v175_v15 = vld [vmem:[%s555_s1 + $0x40] sm:$0xff] (!%p139_p2)  ;;  %v457_v36 = vmov (!%p139_p2), 0   ;;  %vm284_vm2 = vcmask (!%p139_p2), 1043456  }
   0xa   : > { %403 = vmatpush3.bf16.msra.mxu0 (!%p139_p2), %v402_v5  ;;  %v411_v14 = vpack.c.bf16 (!%p139_p2), %v174_v13, %v173_v12  ;;  %v176_v16 = vld [vmem:[%s555_s1 + $0x48] sm:$0xff] (!%p139_p2)  ;;  %v177_v18 = vld [vmem:[%s555_s1 + $0x50] sm:$0xff] (!%p139_p2)  ;;  %v178_v19 = vld [vmem:[%s555_s1 + $0x58] sm:$0xff] (!%p139_p2)  ;;  %439 = vset.pattern.permute.xlu0 (!%p139_p2), %v457_v36 }
   0xb   : > { %404 = vmatprep.subr.bf16.mxu0 (!%p139_p2), %v454_v4  ;;  %v414_v17 = vpack.c.bf16 (!%p139_p2), %v176_v16, %v175_v15  ;;  %v417_v20 = vpack.c.bf16 (!%p139_p2), %v178_v19, %v177_v18  ;;  %v179_v21 = vld [vmem:[%s555_s1 + $0x60] sm:$0xff] (!%p139_p2)  ;;  %v180_v22 = vld [vmem:[%s555_s1 + $0x68] sm:$0xff] (!%p139_p2)  ;;  %v181_v24 = vld [vmem:[%s555_s1 + $0x70] sm:$0xff] (!%p139_p2) }
   0xc   : > { %v420_v23 = vpack.c.bf16 (!%p139_p2), %v180_v22, %v179_v21  ;;  %v182_v25 = vld [vmem:[%s555_s1 + $0x78] sm:$0xff] (!%p139_p2)  ;;  %v346_v28 = vld [vmem:[#allocation2] ss:$0 sm:$0xff] (!%p139_p2) }
   0xd   : > { %v423_v26 = vpack.c.bf16 (!%p139_p2), %v182_v25, %v181_v24 }
   0xe   : > { %406 = vmatpush3.bf16.msra.mxu0 (!%p139_p2), %v405_v8 }
   0xf   : > { %407 = vmatprep.subr.bf16.mxu0 %v454_v4  ;;  %s559_s15 = smov (!%p159_p3, %s340_s15), 1 }
  0x10   : > { %s345_s21 = sshll.u32 %s559_s15, 2  ;;  %s165_s29 = scalar_lea.vmem %s557_s3, %s559_s15 }
  0x11   : > { %s162_s24 = scalar_lea.vmem %s554_s0, %s345_s21 }
  0x12   : > { %409 = vmatpush3.bf16.msra.mxu0 %v408_v11  ;;  %v166_v27 = vld [vmem:[%s162_s24] sm:$0xf] }
  0x13   : > { %410 = vmatprep.subr.bf16.mxu0 %v454_v4 }
  0x16   : > { %412 = vmatpush3.bf16.msra.mxu0 %v411_v14 }
  0x17   : > { %413 = vmatprep.subr.bf16.mxu0 %v454_v4 }
  0x1a   : > { %415 = vmatpush3.bf16.msra.mxu0 %v414_v17 }
  0x1b   : > { %416 = vmatprep.subr.bf16.mxu0 %v454_v4 }
  0x1e   : > { %418 = vmatpush3.bf16.msra.mxu0 %v417_v20 }
  0x1f   : > { %419 = vmatprep.subr.bf16.mxu0 %v454_v4 }
  0x22   : > { %421 = vmatpush3.bf16.msra.mxu0 %v420_v23 }
  0x23   : > { %422 = vmatprep.subr.bf16.mxu0 %v454_v4 }
  0x26   : > { %424 = vmatpush3.bf16.msra.mxu0 %v423_v26 }
  0x29   : > { %399 = vmatmul.mubr.f32.vlgmr.msra.gmra.mrb[0].mxu0 %v166_v27 }
  0xfc   : > { %v256_v29 = vpop.f32.mrb[0].mxu0 }
  0xfd   : > { %v257_v30 = vadd.f32 %v346_v28, %v256_v29  ;;  %v400_v31 = vpop.f32.mrb[1].mxu0 }
  0xff   : > { %440 = vtanh.f32 %v257_v30 }
 0x109   : > { %v441_v32 = vpop.eup %440 }
 0x10a   : > { %v261_v33 = vmul.f32 1.442695, %v441_v32 }
 0x10c   : > { %442 = vpow2.f32 %v261_v33 }
 0x116   : > { %v443_v34 = vpop.eup %442 }
 0x117   : > { %v264_v35 = vsel %vm263_vm1, %v443_v34, 0.0 }
 0x118   : > { %265 = vadd.xlane.f32.xlu0 %v264_v35 }
 0x1a5   : > { %v266_v37 = vpop.xlane.xlu0 %265 }
 0x1a6   : > { %v267_v38 = vrot.slane %v266_v37, 4 }
 0x1a8   : > { %v268_v39 = vadd.f32 %v267_v38, %v266_v37 }
 0x1aa   : > { %v269_v40 = vrot.slane %v268_v39, 2 }
 0x1ac   : > { %v270_v41 = vadd.f32 %v269_v40, %v268_v39 }
 0x1ae   : > { %v271_v42 = vrot.slane %v270_v41, 1 }
 0x1b0   : > { %v272_v43 = vadd.f32 %v271_v42, %v270_v41 }
 0x1b2   : > { %425 = vpush %v272_v43 }
 0x1e3   : > { %s426_s25 = spop %425 }
 0x1e4   : > { %s274_s26 = sadd.f32 1e-06, %s426_s25 }
 0x1e6   : > { %v275_v44 = vstv %s274_s26 }
 0x1e7   : > { %444 = vrcp.f32 %v275_v44 }
 0x1f1   : > { %v445_v45 = vpop.eup %444 }
 0x1f2   : > { %v277_v46 = vmul.f32 %v445_v45, %v443_v34 }
 0x1f4   : > { %280 = vperm.xlu0 %439, %v277_v46  }
 0x273   : > { %v281_v47 = vpop.permute.xlu0 %280 }
 0x274   : > { %v283_v48 = vmul.f32 %v281_v47, %v166_v27 }
 0x276   : > { %v285_v49 = vsel %vm284_vm2, %v283_v48, 0.0 }
 0x277   : > { %v286_v50 = vrot.slane %v285_v49, 4 }
 0x279   : > { %v287_v51 = vadd.f32 %v286_v50, %v285_v49 }
 0x27b   : > { %v288_v52 = vrot.slane %v287_v51, 2 }
 0x27d   : > { %v289_v53 = vadd.f32 %v288_v52, %v287_v51 }
 0x27f   : > { %v290_v54 = vrot.slane %v289_v53, 1 }
 0x281   : > { %v291_v55 = vadd.f32 %v290_v54, %v289_v53 }
 0x283   : > { %292 = vst [vmem:[%s165_s29] sm:$0x1] %v291_v55 }
 0x284 PF: > { %s15_s14 = sadd.s32 1, %s452_s14  }
 0x285   : > { %p12_p4 = scmp.ge.s32.totalorder %s15_s14, 4  }
 0x287   :  { %14 = sbr.rel (!%p12_p4) target bundleno = 3 (0x3), region = 62 }

</bundles_post_ra>
